<compile_context>
chip_gen: v5e
topology: v5e:2x2
jax: 0.10.0
libtpu: 0.0.40
codegen_flags: <defaults>
</compile_context>

<pallas_src>
import functools

import jax
import jax.numpy as jnp
from jax import lax
from jax.experimental import pallas as pl
from jax.experimental.pallas import tpu as pltpu


# ----------------------------------------------------------------------------
# Fused multi-layer LSTM kernel (all layers, all timesteps in one call).
# ----------------------------------------------------------------------------
def _lstm_fused_kernel(*refs, n_layers, seq_t, batch, hidden):
    # refs = [x_ref, (wih_t, whh_t, b) * n_layers, y_ref]
    #   x_ref:  (T*B, D_in)  time-major rows (row t*B + b = timestep t, batch b)
    #   wih_t:  (D_in, 4H)   transposed weight_ih, i/f/o columns pre-scaled 0.5
    #   whh_t:  (H,    4H)   transposed weight_hh, i/f/o columns pre-scaled 0.5
    #   b:      (1,    4H)   (b_ih + b_hh), i/f/o lanes pre-scaled 0.5
    #   y_ref:  (T, B, H)    y[t, b, p] = h_t[b, p] of the LAST layer
    T, B, H = seq_t, batch, hidden
    x_ref = refs[0]
    w_refs = refs[1:1 + 3 * n_layers]
    y_ref = refs[1 + 3 * n_layers]

    wih = [w_refs[3 * l][...] for l in range(n_layers)]       # (D_in, 4H)
    whh = [w_refs[3 * l + 1][...] for l in range(n_layers)]   # (H,   4H)
    bias = [w_refs[3 * l + 2][...] for l in range(n_layers)]  # (1,   4H)

    # Layer-0 input projection hoisted out of the recurrence: one
    # (T*B, D_in) @ (D_in, 4H) matmul for all timesteps.
    xproj0 = jnp.dot(x_ref[...], wih[0],
                     preferred_element_type=jnp.float32) + bias[0]   # (T*B, 4H)

    def cell(gates, c):
        # Single full-width EUP pass: tanh over the whole (B, 4H) block.
        # i/f/o columns were pre-scaled by 0.5, so their sigmoid is 0.5*t + 0.5
        # (cheap VPU work); the g lanes of t are the tanh gate directly.
        t = jnp.tanh(gates)
        s = 0.5 * t + 0.5
        i_g = s[:, 0 * H:1 * H]
        f_g = s[:, 1 * H:2 * H]
        g_g = t[:, 2 * H:3 * H]
        o_g = s[:, 3 * H:4 * H]
        c_new = f_g * c + i_g * g_g
        h_new = o_g * jnp.tanh(c_new)
        return h_new, c_new

    h = [jnp.zeros((B, H), jnp.float32) for _ in range(n_layers)]
    c = [jnp.zeros((B, H), jnp.float32) for _ in range(n_layers)]

    # Static unroll over timesteps; layers processed as a wavefront inside.
    for t in range(T):
        # Layer 0: hoisted projection slice + recurrent matmul.
        gates = xproj0[t * B:(t + 1) * B, :] + jnp.dot(
            h[0], whh[0], preferred_element_type=jnp.float32)        # (B, 4H)
        h[0], c[0] = cell(gates, c[0])

        # Inner layers: per-step input projection from the previous layer's
        # h_t (wavefront: depends only on layer l-1 step t, layer l step t-1).
        for l in range(1, n_layers):
            gates = (jnp.dot(h[l - 1], wih[l],
                             preferred_element_type=jnp.float32)
                     + jnp.dot(h[l], whh[l],
                               preferred_element_type=jnp.float32)
                     + bias[l])
            h[l], c[l] = cell(gates, c[l])
        # NOTE: nn.LSTM inter-layer dropout is inactive at inference.

        # Direct store of the last layer's hidden state (no concat trees,
        # no long SSA live ranges across the unrolled loop).
        y_ref[t] = h[n_layers - 1]


def lstm_forward_pallas(x_enc, params):
    """x_enc: (B, seq_len, enc_in) -> (B, pred_len, enc_in)."""
    B, S, T = x_enc.shape                        # T = enc_in (LSTM seq axis)
    layers = params["layers"]
    L = len(layers)
    H = layers[0]["whh_t"].shape[0]              # pred_len

    # Single fused layout change on the input: (B, S, T) -> (T*B, S).
    x2d = jnp.transpose(x_enc, (2, 0, 1)).reshape(T * B, S).astype(jnp.float32)

    flat_w = []
    for lyr in layers:
        flat_w += [lyr["wih_t"], lyr["whh_t"], lyr["b"]]

    kernel = functools.partial(_lstm_fused_kernel,
                               n_layers=L, seq_t=T, batch=B, hidden=H)
    # Grid-free (single TensorCore) at these toy shapes; see TODO at the top
    # for the gridded restructure required at production shapes / to use both
    # v7x TensorCores for large batches.
    y = pl.pallas_call(
        kernel,
        out_shape=jax.ShapeDtypeStruct((T, B, H), jnp.float32),
        in_specs=[pl.BlockSpec(memory_space=pltpu.MemorySpace.VMEM)]
                 * (1 + 3 * L),
        out_specs=pl.BlockSpec(memory_space=pltpu.MemorySpace.VMEM),
    )(x2d, *flat_w)

    # y[t, b, p] = h_t[b, p]  ->  (B, pred_len, enc_in)
    dec_out = jnp.transpose(y, (1, 2, 0))
    return dec_out                               # == dec_out[:, -pred_len:, :]


model_forward = jax.jit(lstm_forward_pallas)


# ----------------------------------------------------------------------------
# Parameter handling.
# ----------------------------------------------------------------------------
def init_params(key, seq_len, pred_len, e_layers):
    """PyTorch-layout nn.LSTM params: U(-1/sqrt(H), 1/sqrt(H))."""
    H = pred_len
    bound = 1.0 / jnp.sqrt(jnp.float32(H))
    layers = []
    for l in range(e_layers):
        d_in = seq_len if l == 0 else H
        key, k1, k2, k3, k4 = jax.random.split(key, 5)
        layers.append(dict(
            w_ih=jax.random.uniform(k1, (4 * H, d_in), jnp.float32, -bound, bound),
            w_hh=jax.random.uniform(k2, (4 * H, H), jnp.float32, -bound, bound),
            b_ih=jax.random.uniform(k3, (4 * H,), jnp.float32, -bound, bound),
            b_hh=jax.random.uniform(k4, (4 * H,), jnp.float32, -bound, bound),
        ))
    return {"lstm": layers}


def prep_params(raw):
    """One-time prep (outside jit): transpose weights, pre-sum biases, and
    pre-scale the i/f/o gate columns by 0.5 so the kernel needs a single
    tanh pass per step (sigmoid(x) == 0.5 * tanh(x/2) + 0.5)."""
    layers = []
    for lyr in raw["lstm"]:
        H = lyr["w_hh"].shape[1]
        wih_t = jnp.asarray(lyr["w_ih"], jnp.float32).T            # (D_in, 4H)
        whh_t = jnp.asarray(lyr["w_hh"], jnp.float32).T            # (H,   4H)
        b = (jnp.asarray(lyr["b_ih"], jnp.float32)
             + jnp.asarray(lyr["b_hh"], jnp.float32)).reshape(1, 4 * H)
        # Column scale: [i, f, g, o] -> [0.5, 0.5, 1.0, 0.5]
        scale = jnp.concatenate([jnp.full((1, H), 0.5, jnp.float32),
                                 jnp.full((1, H), 0.5, jnp.float32),
                                 jnp.ones((1, H), jnp.float32),
                                 jnp.full((1, H), 0.5, jnp.float32)], axis=1)
        layers.append(dict(wih_t=wih_t * scale,
                           whh_t=whh_t * scale,
                           b=b * scale))
    return {"layers": layers}


# ----------------------------------------------------------------------------
# Pure-JAX reference (lax.scan LSTM, unscaled params) for correctness check.
# ----------------------------------------------------------------------------
def _lstm_layer_ref(x_tbd, w_ih, w_hh, b_ih, b_hh):
    _, B, _ = x_tbd.shape
    H = w_hh.shape[1]

    def step(carry, x_t):
        h, c = carry
        gates = x_t @ w_ih.T + h @ w_hh.T + b_ih + b_hh
        i = jax.nn.sigmoid(gates[:, 0 * H:1 * H])
        f = jax.nn.sigmoid(gates[:, 1 * H:2 * H])
        g = jnp.tanh(gates[:, 2 * H:3 * H])
        o = jax.nn.sigmoid(gates[:, 3 * H:4 * H])
        c = f * c + i * g
        h = o * jnp.tanh(c)
        return (h, c), h

    init = (jnp.zeros((B, H), jnp.float32), jnp.zeros((B, H), jnp.float32))
    _, ys = lax.scan(step, init, x_tbd)
    return ys


def model_forward_ref(x_enc, raw_params):
    x = jnp.transpose(x_enc, (0, 2, 1))
    x = jnp.transpose(x, (1, 0, 2))              # (T, B, seq_len)
    for layer in raw_params["lstm"]:
        x = _lstm_layer_ref(x, layer["w_ih"], layer["w_hh"],
                            layer["b_ih"], layer["b_hh"])
    x = jnp.transpose(x, (1, 0, 2))
    return jnp.transpose(x, (0, 2, 1))


if __name__ == "__main__":
    # Small config: task_name='long_term_forecast', seq_len=16, pred_len=32,
    # enc_in=8, e_layers=2, dropout=0.0
    B, SEQ_LEN, PRED_LEN, ENC_IN, E_LAYERS = 2, 16, 32, 8, 2

    key = jax.random.PRNGKey(0)
    key, kx, kp = jax.random.split(key, 3)
    x_enc = jax.random.normal(kx, (B, SEQ_LEN, ENC_IN), jnp.float32)
    raw_params = init_params(kp, SEQ_LEN, PRED_LEN, E_LAYERS)
    params = prep_params(raw_params)             # one-time weight prep

    out = jax.block_until_ready(model_forward(x_enc, params))
    assert out.shape == (B, PRED_LEN, ENC_IN), out.shape

    ref = jax.block_until_ready(model_forward_ref(x_enc, raw_params))
    # Slightly relaxed vs 1e-5: the single-tanh sigmoid rewrite is exact up to
    # the transcendental implementation (sigmoid(x) == 0.5*tanh(x/2)+0.5).
    assert jnp.allclose(out, ref, atol=2e-5, rtol=1e-5), \
        float(jnp.max(jnp.abs(out - ref)))

    print("KERNEL_OK")
</pallas_src>

<mosaic_0001>
module attributes {stable_mosaic.version = 11 : i64} {
  func.func @_lstm_fused_kernel(%arg0: memref<16x16xf32, #tpu.memory_space<vmem>>, %arg1: memref<16x128xf32, #tpu.memory_space<vmem>>, %arg2: memref<32x128xf32, #tpu.memory_space<vmem>>, %arg3: memref<1x128xf32, #tpu.memory_space<vmem>>, %arg4: memref<32x128xf32, #tpu.memory_space<vmem>>, %arg5: memref<32x128xf32, #tpu.memory_space<vmem>>, %arg6: memref<1x128xf32, #tpu.memory_space<vmem>>, %arg7: memref<8x2x32xf32, #tpu.memory_space<vmem>>) attributes {dimension_semantics = [], scalar_prefetch = 0 : i64, scratch_operands = 0 : i64, tpu.core_type = #tpu.core_type<tc>} {
    %c0 = arith.constant 0 : index
    %c0_0 = arith.constant 0 : index
    %0 = vector.load %arg1[%c0, %c0_0] : memref<16x128xf32, #tpu.memory_space<vmem>>, vector<16x128xf32>
    %c0_1 = arith.constant 0 : index
    %c0_2 = arith.constant 0 : index
    %1 = vector.load %arg4[%c0_1, %c0_2] : memref<32x128xf32, #tpu.memory_space<vmem>>, vector<32x128xf32>
    %c0_3 = arith.constant 0 : index
    %c0_4 = arith.constant 0 : index
    %2 = vector.load %arg2[%c0_3, %c0_4] : memref<32x128xf32, #tpu.memory_space<vmem>>, vector<32x128xf32>
    %c0_5 = arith.constant 0 : index
    %c0_6 = arith.constant 0 : index
    %3 = vector.load %arg5[%c0_5, %c0_6] : memref<32x128xf32, #tpu.memory_space<vmem>>, vector<32x128xf32>
    %c0_7 = arith.constant 0 : index
    %c0_8 = arith.constant 0 : index
    %4 = vector.load %arg3[%c0_7, %c0_8] : memref<1x128xf32, #tpu.memory_space<vmem>>, vector<1x128xf32>
    %c0_9 = arith.constant 0 : index
    %c0_10 = arith.constant 0 : index
    %5 = vector.load %arg6[%c0_9, %c0_10] : memref<1x128xf32, #tpu.memory_space<vmem>>, vector<1x128xf32>
    %c0_11 = arith.constant 0 : index
    %c0_12 = arith.constant 0 : index
    %6 = vector.load %arg0[%c0_11, %c0_12] : memref<16x16xf32, #tpu.memory_space<vmem>>, vector<16x16xf32>
    %cst = arith.constant dense<0.000000e+00> : vector<16x128xf32>
    %7 = tpu.matmul %6, %0, %cst {dimension_numbers = #tpu.dot_dimension_numbers<[1], [0], [0], [1], [0, 0, 1, 1], [], []>} : vector<16x16xf32>, vector<16x128xf32>, vector<16x128xf32> -> vector<16x128xf32>
    %8 = vector.broadcast %4 : vector<1x128xf32> to vector<16x128xf32>
    %9 = arith.addf %7, %8 : vector<16x128xf32>
    %cst_13 = arith.constant 0.000000e+00 : f32
    %10 = vector.broadcast %cst_13 : f32 to vector<2x32xf32>
    %cst_14 = arith.constant 0.000000e+00 : f32
    %11 = vector.broadcast %cst_14 : f32 to vector<2x32xf32>
    %cst_15 = arith.constant 0.000000e+00 : f32
    %12 = vector.broadcast %cst_15 : f32 to vector<2x32xf32>
    %cst_16 = arith.constant 0.000000e+00 : f32
    %13 = vector.broadcast %cst_16 : f32 to vector<2x32xf32>
    %14 = vector.extract_strided_slice %9 {offsets = [0, 0], sizes = [2, 128], strides = [1, 1]} : vector<16x128xf32> to vector<2x128xf32>
    %cst_17 = arith.constant dense<0.000000e+00> : vector<2x128xf32>
    %15 = tpu.matmul %10, %2, %cst_17 {dimension_numbers = #tpu.dot_dimension_numbers<[1], [0], [0], [1], [0, 0, 1, 1], [], []>} : vector<2x32xf32>, vector<32x128xf32>, vector<2x128xf32> -> vector<2x128xf32>
    %16 = arith.addf %14, %15 : vector<2x128xf32>
    %17 = math.tanh %16 : vector<2x128xf32>
    %cst_18 = arith.constant 5.000000e-01 : f32
    %18 = vector.broadcast %cst_18 : f32 to vector<2x128xf32>
    %19 = arith.mulf %18, %17 : vector<2x128xf32>
    %cst_19 = arith.constant 5.000000e-01 : f32
    %20 = vector.broadcast %cst_19 : f32 to vector<2x128xf32>
    %21 = arith.addf %19, %20 : vector<2x128xf32>
    %22 = vector.extract_strided_slice %21 {offsets = [0, 0], sizes = [2, 32], strides = [1, 1]} : vector<2x128xf32> to vector<2x32xf32>
    %23 = vector.extract_strided_slice %21 {offsets = [0, 32], sizes = [2, 32], strides = [1, 1]} : vector<2x128xf32> to vector<2x32xf32>
    %24 = vector.extract_strided_slice %17 {offsets = [0, 64], sizes = [2, 32], strides = [1, 1]} : vector<2x128xf32> to vector<2x32xf32>
    %25 = vector.extract_strided_slice %21 {offsets = [0, 96], sizes = [2, 32], strides = [1, 1]} : vector<2x128xf32> to vector<2x32xf32>
    %26 = arith.mulf %23, %12 : vector<2x32xf32>
    %27 = arith.mulf %22, %24 : vector<2x32xf32>
    %28 = arith.addf %26, %27 : vector<2x32xf32>
    %29 = math.tanh %28 : vector<2x32xf32>
    %30 = arith.mulf %25, %29 : vector<2x32xf32>
    %cst_20 = arith.constant dense<0.000000e+00> : vector<2x128xf32>
    %31 = tpu.matmul %30, %1, %cst_20 {dimension_numbers = #tpu.dot_dimension_numbers<[1], [0], [0], [1], [0, 0, 1, 1], [], []>} : vector<2x32xf32>, vector<32x128xf32>, vector<2x128xf32> -> vector<2x128xf32>
    %cst_21 = arith.constant dense<0.000000e+00> : vector<2x128xf32>
    %32 = tpu.matmul %11, %3, %cst_21 {dimension_numbers = #tpu.dot_dimension_numbers<[1], [0], [0], [1], [0, 0, 1, 1], [], []>} : vector<2x32xf32>, vector<32x128xf32>, vector<2x128xf32> -> vector<2x128xf32>
    %33 = arith.addf %31, %32 : vector<2x128xf32>
    %34 = vector.broadcast %5 : vector<1x128xf32> to vector<2x128xf32>
    %35 = arith.addf %33, %34 : vector<2x128xf32>
    %36 = math.tanh %35 : vector<2x128xf32>
    %cst_22 = arith.constant 5.000000e-01 : f32
    %37 = vector.broadcast %cst_22 : f32 to vector<2x128xf32>
    %38 = arith.mulf %37, %36 : vector<2x128xf32>
    %cst_23 = arith.constant 5.000000e-01 : f32
    %39 = vector.broadcast %cst_23 : f32 to vector<2x128xf32>
    %40 = arith.addf %38, %39 : vector<2x128xf32>
    %41 = vector.extract_strided_slice %40 {offsets = [0, 0], sizes = [2, 32], strides = [1, 1]} : vector<2x128xf32> to vector<2x32xf32>
    %42 = vector.extract_strided_slice %40 {offsets = [0, 32], sizes = [2, 32], strides = [1, 1]} : vector<2x128xf32> to vector<2x32xf32>
    %43 = vector.extract_strided_slice %36 {offsets = [0, 64], sizes = [2, 32], strides = [1, 1]} : vector<2x128xf32> to vector<2x32xf32>
    %44 = vector.extract_strided_slice %40 {offsets = [0, 96], sizes = [2, 32], strides = [1, 1]} : vector<2x128xf32> to vector<2x32xf32>
    %45 = arith.mulf %42, %13 : vector<2x32xf32>
    %46 = arith.mulf %41, %43 : vector<2x32xf32>
    %47 = arith.addf %45, %46 : vector<2x32xf32>
    %48 = math.tanh %47 : vector<2x32xf32>
    %49 = arith.mulf %44, %48 : vector<2x32xf32>
    %c0_24 = arith.constant 0 : index
    %c0_25 = arith.constant 0 : index
    %c0_26 = arith.constant 0 : index
    %50 = vector.load %arg7[%c0_24, %c0_25, %c0_26] : memref<8x2x32xf32, #tpu.memory_space<vmem>>, vector<1x2x32xf32>
    %51 = vector.shape_cast %50 : vector<1x2x32xf32> to vector<2x32xf32>
    %52 = vector.shape_cast %49 : vector<2x32xf32> to vector<1x2x32xf32>
    tpu.vector_store %arg7[%c0_24, %c0_25, %c0_26], %52 {strides = array<i32>} : memref<8x2x32xf32, #tpu.memory_space<vmem>>, vector<1x2x32xf32>,
    %53 = vector.extract_strided_slice %9 {offsets = [2, 0], sizes = [2, 128], strides = [1, 1]} : vector<16x128xf32> to vector<2x128xf32>
    %cst_27 = arith.constant dense<0.000000e+00> : vector<2x128xf32>
    %54 = tpu.matmul %30, %2, %cst_27 {dimension_numbers = #tpu.dot_dimension_numbers<[1], [0], [0], [1], [0, 0, 1, 1], [], []>} : vector<2x32xf32>, vector<32x128xf32>, vector<2x128xf32> -> vector<2x128xf32>
    %55 = arith.addf %53, %54 : vector<2x128xf32>
    %56 = math.tanh %55 : vector<2x128xf32>
    %cst_28 = arith.constant 5.000000e-01 : f32
    %57 = vector.broadcast %cst_28 : f32 to vector<2x128xf32>
    %58 = arith.mulf %57, %56 : vector<2x128xf32>
    %cst_29 = arith.constant 5.000000e-01 : f32
    %59 = vector.broadcast %cst_29 : f32 to vector<2x128xf32>
    %60 = arith.addf %58, %59 : vector<2x128xf32>
    %61 = vector.extract_strided_slice %60 {offsets = [0, 0], sizes = [2, 32], strides = [1, 1]} : vector<2x128xf32> to vector<2x32xf32>
    %62 = vector.extract_strided_slice %60 {offsets = [0, 32], sizes = [2, 32], strides = [1, 1]} : vector<2x128xf32> to vector<2x32xf32>
    %63 = vector.extract_strided_slice %56 {offsets = [0, 64], sizes = [2, 32], strides = [1, 1]} : vector<2x128xf32> to vector<2x32xf32>
    %64 = vector.extract_strided_slice %60 {offsets = [0, 96], sizes = [2, 32], strides = [1, 1]} : vector<2x128xf32> to vector<2x32xf32>
    %65 = arith.mulf %62, %28 : vector<2x32xf32>
    %66 = arith.mulf %61, %63 : vector<2x32xf32>
    %67 = arith.addf %65, %66 : vector<2x32xf32>
    %68 = math.tanh %67 : vector<2x32xf32>
    %69 = arith.mulf %64, %68 : vector<2x32xf32>
    %cst_30 = arith.constant dense<0.000000e+00> : vector<2x128xf32>
    %70 = tpu.matmul %69, %1, %cst_30 {dimension_numbers = #tpu.dot_dimension_numbers<[1], [0], [0], [1], [0, 0, 1, 1], [], []>} : vector<2x32xf32>, vector<32x128xf32>, vector<2x128xf32> -> vector<2x128xf32>
    %cst_31 = arith.constant dense<0.000000e+00> : vector<2x128xf32>
    %71 = tpu.matmul %49, %3, %cst_31 {dimension_numbers = #tpu.dot_dimension_numbers<[1], [0], [0], [1], [0, 0, 1, 1], [], []>} : vector<2x32xf32>, vector<32x128xf32>, vector<2x128xf32> -> vector<2x128xf32>
    %72 = arith.addf %70, %71 : vector<2x128xf32>
    %73 = vector.broadcast %5 : vector<1x128xf32> to vector<2x128xf32>
    %74 = arith.addf %72, %73 : vector<2x128xf32>
    %75 = math.tanh %74 : vector<2x128xf32>
    %cst_32 = arith.constant 5.000000e-01 : f32
    %76 = vector.broadcast %cst_32 : f32 to vector<2x128xf32>
    %77 = arith.mulf %76, %75 : vector<2x128xf32>
    %cst_33 = arith.constant 5.000000e-01 : f32
    %78 = vector.broadcast %cst_33 : f32 to vector<2x128xf32>
    %79 = arith.addf %77, %78 : vector<2x128xf32>
    %80 = vector.extract_strided_slice %79 {offsets = [0, 0], sizes = [2, 32], strides = [1, 1]} : vector<2x128xf32> to vector<2x32xf32>
    %81 = vector.extract_strided_slice %79 {offsets = [0, 32], sizes = [2, 32], strides = [1, 1]} : vector<2x128xf32> to vector<2x32xf32>
    %82 = vector.extract_strided_slice %75 {offsets = [0, 64], sizes = [2, 32], strides = [1, 1]} : vector<2x128xf32> to vector<2x32xf32>
    %83 = vector.extract_strided_slice %79 {offsets = [0, 96], sizes = [2, 32], strides = [1, 1]} : vector<2x128xf32> to vector<2x32xf32>
    %84 = arith.mulf %81, %47 : vector<2x32xf32>
    %85 = arith.mulf %80, %82 : vector<2x32xf32>
    %86 = arith.addf %84, %85 : vector<2x32xf32>
    %87 = math.tanh %86 : vector<2x32xf32>
    %88 = arith.mulf %83, %87 : vector<2x32xf32>
    %c1 = arith.constant 1 : index
    %c0_34 = arith.constant 0 : index
    %c0_35 = arith.constant 0 : index
    %89 = vector.load %arg7[%c1, %c0_34, %c0_35] : memref<8x2x32xf32, #tpu.memory_space<vmem>>, vector<1x2x32xf32>
    %90 = vector.shape_cast %89 : vector<1x2x32xf32> to vector<2x32xf32>
    %91 = vector.shape_cast %88 : vector<2x32xf32> to vector<1x2x32xf32>
    tpu.vector_store %arg7[%c1, %c0_34, %c0_35], %91 {strides = array<i32>} : memref<8x2x32xf32, #tpu.memory_space<vmem>>, vector<1x2x32xf32>,
    %92 = vector.extract_strided_slice %9 {offsets = [4, 0], sizes = [2, 128], strides = [1, 1]} : vector<16x128xf32> to vector<2x128xf32>
    %cst_36 = arith.constant dense<0.000000e+00> : vector<2x128xf32>
    %93 = tpu.matmul %69, %2, %cst_36 {dimension_numbers = #tpu.dot_dimension_numbers<[1], [0], [0], [1], [0, 0, 1, 1], [], []>} : vector<2x32xf32>, vector<32x128xf32>, vector<2x128xf32> -> vector<2x128xf32>
    %94 = arith.addf %92, %93 : vector<2x128xf32>
    %95 = math.tanh %94 : vector<2x128xf32>
    %cst_37 = arith.constant 5.000000e-01 : f32
    %96 = vector.broadcast %cst_37 : f32 to vector<2x128xf32>
    %97 = arith.mulf %96, %95 : vector<2x128xf32>
    %cst_38 = arith.constant 5.000000e-01 : f32
    %98 = vector.broadcast %cst_38 : f32 to vector<2x128xf32>
    %99 = arith.addf %97, %98 : vector<2x128xf32>
    %100 = vector.extract_strided_slice %99 {offsets = [0, 0], sizes = [2, 32], strides = [1, 1]} : vector<2x128xf32> to vector<2x32xf32>
    %101 = vector.extract_strided_slice %99 {offsets = [0, 32], sizes = [2, 32], strides = [1, 1]} : vector<2x128xf32> to vector<2x32xf32>
    %102 = vector.extract_strided_slice %95 {offsets = [0, 64], sizes = [2, 32], strides = [1, 1]} : vector<2x128xf32> to vector<2x32xf32>
    %103 = vector.extract_strided_slice %99 {offsets = [0, 96], sizes = [2, 32], strides = [1, 1]} : vector<2x128xf32> to vector<2x32xf32>
    %104 = arith.mulf %101, %67 : vector<2x32xf32>
    %105 = arith.mulf %100, %102 : vector<2x32xf32>
    %106 = arith.addf %104, %105 : vector<2x32xf32>
    %107 = math.tanh %106 : vector<2x32xf32>
    %108 = arith.mulf %103, %107 : vector<2x32xf32>
    %cst_39 = arith.constant dense<0.000000e+00> : vector<2x128xf32>
    %109 = tpu.matmul %108, %1, %cst_39 {dimension_numbers = #tpu.dot_dimension_numbers<[1], [0], [0], [1], [0, 0, 1, 1], [], []>} : vector<2x32xf32>, vector<32x128xf32>, vector<2x128xf32> -> vector<2x128xf32>
    %cst_40 = arith.constant dense<0.000000e+00> : vector<2x128xf32>
    %110 = tpu.matmul %88, %3, %cst_40 {dimension_numbers = #tpu.dot_dimension_numbers<[1], [0], [0], [1], [0, 0, 1, 1], [], []>} : vector<2x32xf32>, vector<32x128xf32>, vector<2x128xf32> -> vector<2x128xf32>
    %111 = arith.addf %109, %110 : vector<2x128xf32>
    %112 = vector.broadcast %5 : vector<1x128xf32> to vector<2x128xf32>
    %113 = arith.addf %111, %112 : vector<2x128xf32>
    %114 = math.tanh %113 : vector<2x128xf32>
    %cst_41 = arith.constant 5.000000e-01 : f32
    %115 = vector.broadcast %cst_41 : f32 to vector<2x128xf32>
    %116 = arith.mulf %115, %114 : vector<2x128xf32>
    %cst_42 = arith.constant 5.000000e-01 : f32
    %117 = vector.broadcast %cst_42 : f32 to vector<2x128xf32>
    %118 = arith.addf %116, %117 : vector<2x128xf32>
    %119 = vector.extract_strided_slice %118 {offsets = [0, 0], sizes = [2, 32], strides = [1, 1]} : vector<2x128xf32> to vector<2x32xf32>
    %120 = vector.extract_strided_slice %118 {offsets = [0, 32], sizes = [2, 32], strides = [1, 1]} : vector<2x128xf32> to vector<2x32xf32>
    %121 = vector.extract_strided_slice %114 {offsets = [0, 64], sizes = [2, 32], strides = [1, 1]} : vector<2x128xf32> to vector<2x32xf32>
    %122 = vector.extract_strided_slice %118 {offsets = [0, 96], sizes = [2, 32], strides = [1, 1]} : vector<2x128xf32> to vector<2x32xf32>
    %123 = arith.mulf %120, %86 : vector<2x32xf32>
    %124 = arith.mulf %119, %121 : vector<2x32xf32>
    %125 = arith.addf %123, %124 : vector<2x32xf32>
    %126 = math.tanh %125 : vector<2x32xf32>
    %127 = arith.mulf %122, %126 : vector<2x32xf32>
    %c2 = arith.constant 2 : index
    %c0_43 = arith.constant 0 : index
    %c0_44 = arith.constant 0 : index
    %128 = vector.load %arg7[%c2, %c0_43, %c0_44] : memref<8x2x32xf32, #tpu.memory_space<vmem>>, vector<1x2x32xf32>
    %129 = vector.shape_cast %128 : vector<1x2x32xf32> to vector<2x32xf32>
    %130 = vector.shape_cast %127 : vector<2x32xf32> to vector<1x2x32xf32>
    tpu.vector_store %arg7[%c2, %c0_43, %c0_44], %130 {strides = array<i32>} : memref<8x2x32xf32, #tpu.memory_space<vmem>>, vector<1x2x32xf32>,
    %131 = vector.extract_strided_slice %9 {offsets = [6, 0], sizes = [2, 128], strides = [1, 1]} : vector<16x128xf32> to vector<2x128xf32>
    %cst_45 = arith.constant dense<0.000000e+00> : vector<2x128xf32>
    %132 = tpu.matmul %108, %2, %cst_45 {dimension_numbers = #tpu.dot_dimension_numbers<[1], [0], [0], [1], [0, 0, 1, 1], [], []>} : vector<2x32xf32>, vector<32x128xf32>, vector<2x128xf32> -> vector<2x128xf32>
    %133 = arith.addf %131, %132 : vector<2x128xf32>
    %134 = math.tanh %133 : vector<2x128xf32>
    %cst_46 = arith.constant 5.000000e-01 : f32
    %135 = vector.broadcast %cst_46 : f32 to vector<2x128xf32>
    %136 = arith.mulf %135, %134 : vector<2x128xf32>
    %cst_47 = arith.constant 5.000000e-01 : f32
    %137 = vector.broadcast %cst_47 : f32 to vector<2x128xf32>
    %138 = arith.addf %136, %137 : vector<2x128xf32>
    %139 = vector.extract_strided_slice %138 {offsets = [0, 0], sizes = [2, 32], strides = [1, 1]} : vector<2x128xf32> to vector<2x32xf32>
    %140 = vector.extract_strided_slice %138 {offsets = [0, 32], sizes = [2, 32], strides = [1, 1]} : vector<2x128xf32> to vector<2x32xf32>
    %141 = vector.extract_strided_slice %134 {offsets = [0, 64], sizes = [2, 32], strides = [1, 1]} : vector<2x128xf32> to vector<2x32xf32>
    %142 = vector.extract_strided_slice %138 {offsets = [0, 96], sizes = [2, 32], strides = [1, 1]} : vector<2x128xf32> to vector<2x32xf32>
    %143 = arith.mulf %140, %106 : vector<2x32xf32>
    %144 = arith.mulf %139, %141 : vector<2x32xf32>
    %145 = arith.addf %143, %144 : vector<2x32xf32>
    %146 = math.tanh %145 : vector<2x32xf32>
    %147 = arith.mulf %142, %146 : vector<2x32xf32>
    %cst_48 = arith.constant dense<0.000000e+00> : vector<2x128xf32>
    %148 = tpu.matmul %147, %1, %cst_48 {dimension_numbers = #tpu.dot_dimension_numbers<[1], [0], [0], [1], [0, 0, 1, 1], [], []>} : vector<2x32xf32>, vector<32x128xf32>, vector<2x128xf32> -> vector<2x128xf32>
    %cst_49 = arith.constant dense<0.000000e+00> : vector<2x128xf32>
    %149 = tpu.matmul %127, %3, %cst_49 {dimension_numbers = #tpu.dot_dimension_numbers<[1], [0], [0], [1], [0, 0, 1, 1], [], []>} : vector<2x32xf32>, vector<32x128xf32>, vector<2x128xf32> -> vector<2x128xf32>
    %150 = arith.addf %148, %149 : vector<2x128xf32>
    %151 = vector.broadcast %5 : vector<1x128xf32> to vector<2x128xf32>
    %152 = arith.addf %150, %151 : vector<2x128xf32>
    %153 = math.tanh %152 : vector<2x128xf32>
    %cst_50 = arith.constant 5.000000e-01 : f32
    %154 = vector.broadcast %cst_50 : f32 to vector<2x128xf32>
    %155 = arith.mulf %154, %153 : vector<2x128xf32>
    %cst_51 = arith.constant 5.000000e-01 : f32
    %156 = vector.broadcast %cst_51 : f32 to vector<2x128xf32>
    %157 = arith.addf %155, %156 : vector<2x128xf32>
    %158 = vector.extract_strided_slice %157 {offsets = [0, 0], sizes = [2, 32], strides = [1, 1]} : vector<2x128xf32> to vector<2x32xf32>
    %159 = vector.extract_strided_slice %157 {offsets = [0, 32], sizes = [2, 32], strides = [1, 1]} : vector<2x128xf32> to vector<2x32xf32>
    %160 = vector.extract_strided_slice %153 {offsets = [0, 64], sizes = [2, 32], strides = [1, 1]} : vector<2x128xf32> to vector<2x32xf32>
    %161 = vector.extract_strided_slice %157 {offsets = [0, 96], sizes = [2, 32], strides = [1, 1]} : vector<2x128xf32> to vector<2x32xf32>
    %162 = arith.mulf %159, %125 : vector<2x32xf32>
    %163 = arith.mulf %158, %160 : vector<2x32xf32>
    %164 = arith.addf %162, %163 : vector<2x32xf32>
    %165 = math.tanh %164 : vector<2x32xf32>
    %166 = arith.mulf %161, %165 : vector<2x32xf32>
    %c3 = arith.constant 3 : index
    %c0_52 = arith.constant 0 : index
    %c0_53 = arith.constant 0 : index
    %167 = vector.load %arg7[%c3, %c0_52, %c0_53] : memref<8x2x32xf32, #tpu.memory_space<vmem>>, vector<1x2x32xf32>
    %168 = vector.shape_cast %167 : vector<1x2x32xf32> to vector<2x32xf32>
    %169 = vector.shape_cast %166 : vector<2x32xf32> to vector<1x2x32xf32>
    tpu.vector_store %arg7[%c3, %c0_52, %c0_53], %169 {strides = array<i32>} : memref<8x2x32xf32, #tpu.memory_space<vmem>>, vector<1x2x32xf32>,
    %170 = vector.extract_strided_slice %9 {offsets = [8, 0], sizes = [2, 128], strides = [1, 1]} : vector<16x128xf32> to vector<2x128xf32>
    %cst_54 = arith.constant dense<0.000000e+00> : vector<2x128xf32>
    %171 = tpu.matmul %147, %2, %cst_54 {dimension_numbers = #tpu.dot_dimension_numbers<[1], [0], [0], [1], [0, 0, 1, 1], [], []>} : vector<2x32xf32>, vector<32x128xf32>, vector<2x128xf32> -> vector<2x128xf32>
    %172 = arith.addf %170, %171 : vector<2x128xf32>
    %173 = math.tanh %172 : vector<2x128xf32>
    %cst_55 = arith.constant 5.000000e-01 : f32
    %174 = vector.broadcast %cst_55 : f32 to vector<2x128xf32>
    %175 = arith.mulf %174, %173 : vector<2x128xf32>
    %cst_56 = arith.constant 5.000000e-01 : f32
    %176 = vector.broadcast %cst_56 : f32 to vector<2x128xf32>
    %177 = arith.addf %175, %176 : vector<2x128xf32>
    %178 = vector.extract_strided_slice %177 {offsets = [0, 0], sizes = [2, 32], strides = [1, 1]} : vector<2x128xf32> to vector<2x32xf32>
    %179 = vector.extract_strided_slice %177 {offsets = [0, 32], sizes = [2, 32], strides = [1, 1]} : vector<2x128xf32> to vector<2x32xf32>
    %180 = vector.extract_strided_slice %173 {offsets = [0, 64], sizes = [2, 32], strides = [1, 1]} : vector<2x128xf32> to vector<2x32xf32>
    %181 = vector.extract_strided_slice %177 {offsets = [0, 96], sizes = [2, 32], strides = [1, 1]} : vector<2x128xf32> to vector<2x32xf32>
    %182 = arith.mulf %179, %145 : vector<2x32xf32>
    %183 = arith.mulf %178, %180 : vector<2x32xf32>
    %184 = arith.addf %182, %183 : vector<2x32xf32>
    %185 = math.tanh %184 : vector<2x32xf32>
    %186 = arith.mulf %181, %185 : vector<2x32xf32>
    %cst_57 = arith.constant dense<0.000000e+00> : vector<2x128xf32>
    %187 = tpu.matmul %186, %1, %cst_57 {dimension_numbers = #tpu.dot_dimension_numbers<[1], [0], [0], [1], [0, 0, 1, 1], [], []>} : vector<2x32xf32>, vector<32x128xf32>, vector<2x128xf32> -> vector<2x128xf32>
    %cst_58 = arith.constant dense<0.000000e+00> : vector<2x128xf32>
    %188 = tpu.matmul %166, %3, %cst_58 {dimension_numbers = #tpu.dot_dimension_numbers<[1], [0], [0], [1], [0, 0, 1, 1], [], []>} : vector<2x32xf32>, vector<32x128xf32>, vector<2x128xf32> -> vector<2x128xf32>
    %189 = arith.addf %187, %188 : vector<2x128xf32>
    %190 = vector.broadcast %5 : vector<1x128xf32> to vector<2x128xf32>
    %191 = arith.addf %189, %190 : vector<2x128xf32>
    %192 = math.tanh %191 : vector<2x128xf32>
    %cst_59 = arith.constant 5.000000e-01 : f32
    %193 = vector.broadcast %cst_59 : f32 to vector<2x128xf32>
    %194 = arith.mulf %193, %192 : vector<2x128xf32>
    %cst_60 = arith.constant 5.000000e-01 : f32
    %195 = vector.broadcast %cst_60 : f32 to vector<2x128xf32>
    %196 = arith.addf %194, %195 : vector<2x128xf32>
    %197 = vector.extract_strided_slice %196 {offsets = [0, 0], sizes = [2, 32], strides = [1, 1]} : vector<2x128xf32> to vector<2x32xf32>
    %198 = vector.extract_strided_slice %196 {offsets = [0, 32], sizes = [2, 32], strides = [1, 1]} : vector<2x128xf32> to vector<2x32xf32>
    %199 = vector.extract_strided_slice %192 {offsets = [0, 64], sizes = [2, 32], strides = [1, 1]} : vector<2x128xf32> to vector<2x32xf32>
    %200 = vector.extract_strided_slice %196 {offsets = [0, 96], sizes = [2, 32], strides = [1, 1]} : vector<2x128xf32> to vector<2x32xf32>
    %201 = arith.mulf %198, %164 : vector<2x32xf32>
    %202 = arith.mulf %197, %199 : vector<2x32xf32>
    %203 = arith.addf %201, %202 : vector<2x32xf32>
    %204 = math.tanh %203 : vector<2x32xf32>
    %205 = arith.mulf %200, %204 : vector<2x32xf32>
    %c4 = arith.constant 4 : index
    %c0_61 = arith.constant 0 : index
    %c0_62 = arith.constant 0 : index
    %206 = vector.load %arg7[%c4, %c0_61, %c0_62] : memref<8x2x32xf32, #tpu.memory_space<vmem>>, vector<1x2x32xf32>
    %207 = vector.shape_cast %206 : vector<1x2x32xf32> to vector<2x32xf32>
    %208 = vector.shape_cast %205 : vector<2x32xf32> to vector<1x2x32xf32>
    tpu.vector_store %arg7[%c4, %c0_61, %c0_62], %208 {strides = array<i32>} : memref<8x2x32xf32, #tpu.memory_space<vmem>>, vector<1x2x32xf32>,
    %209 = vector.extract_strided_slice %9 {offsets = [10, 0], sizes = [2, 128], strides = [1, 1]} : vector<16x128xf32> to vector<2x128xf32>
    %cst_63 = arith.constant dense<0.000000e+00> : vector<2x128xf32>
    %210 = tpu.matmul %186, %2, %cst_63 {dimension_numbers = #tpu.dot_dimension_numbers<[1], [0], [0], [1], [0, 0, 1, 1], [], []>} : vector<2x32xf32>, vector<32x128xf32>, vector<2x128xf32> -> vector<2x128xf32>
    %211 = arith.addf %209, %210 : vector<2x128xf32>
    %212 = math.tanh %211 : vector<2x128xf32>
    %cst_64 = arith.constant 5.000000e-01 : f32
    %213 = vector.broadcast %cst_64 : f32 to vector<2x128xf32>
    %214 = arith.mulf %213, %212 : vector<2x128xf32>
    %cst_65 = arith.constant 5.000000e-01 : f32
    %215 = vector.broadcast %cst_65 : f32 to vector<2x128xf32>
    %216 = arith.addf %214, %215 : vector<2x128xf32>
    %217 = vector.extract_strided_slice %216 {offsets = [0, 0], sizes = [2, 32], strides = [1, 1]} : vector<2x128xf32> to vector<2x32xf32>
    %218 = vector.extract_strided_slice %216 {offsets = [0, 32], sizes = [2, 32], strides = [1, 1]} : vector<2x128xf32> to vector<2x32xf32>
    %219 = vector.extract_strided_slice %212 {offsets = [0, 64], sizes = [2, 32], strides = [1, 1]} : vector<2x128xf32> to vector<2x32xf32>
    %220 = vector.extract_strided_slice %216 {offsets = [0, 96], sizes = [2, 32], strides = [1, 1]} : vector<2x128xf32> to vector<2x32xf32>
    %221 = arith.mulf %218, %184 : vector<2x32xf32>
    %222 = arith.mulf %217, %219 : vector<2x32xf32>
    %223 = arith.addf %221, %222 : vector<2x32xf32>
    %224 = math.tanh %223 : vector<2x32xf32>
    %225 = arith.mulf %220, %224 : vector<2x32xf32>
    %cst_66 = arith.constant dense<0.000000e+00> : vector<2x128xf32>
    %226 = tpu.matmul %225, %1, %cst_66 {dimension_numbers = #tpu.dot_dimension_numbers<[1], [0], [0], [1], [0, 0, 1, 1], [], []>} : vector<2x32xf32>, vector<32x128xf32>, vector<2x128xf32> -> vector<2x128xf32>
    %cst_67 = arith.constant dense<0.000000e+00> : vector<2x128xf32>
    %227 = tpu.matmul %205, %3, %cst_67 {dimension_numbers = #tpu.dot_dimension_numbers<[1], [0], [0], [1], [0, 0, 1, 1], [], []>} : vector<2x32xf32>, vector<32x128xf32>, vector<2x128xf32> -> vector<2x128xf32>
    %228 = arith.addf %226, %227 : vector<2x128xf32>
    %229 = vector.broadcast %5 : vector<1x128xf32> to vector<2x128xf32>
    %230 = arith.addf %228, %229 : vector<2x128xf32>
    %231 = math.tanh %230 : vector<2x128xf32>
    %cst_68 = arith.constant 5.000000e-01 : f32
    %232 = vector.broadcast %cst_68 : f32 to vector<2x128xf32>
    %233 = arith.mulf %232, %231 : vector<2x128xf32>
    %cst_69 = arith.constant 5.000000e-01 : f32
    %234 = vector.broadcast %cst_69 : f32 to vector<2x128xf32>
    %235 = arith.addf %233, %234 : vector<2x128xf32>
    %236 = vector.extract_strided_slice %235 {offsets = [0, 0], sizes = [2, 32], strides = [1, 1]} : vector<2x128xf32> to vector<2x32xf32>
    %237 = vector.extract_strided_slice %235 {offsets = [0, 32], sizes = [2, 32], strides = [1, 1]} : vector<2x128xf32> to vector<2x32xf32>
    %238 = vector.extract_strided_slice %231 {offsets = [0, 64], sizes = [2, 32], strides = [1, 1]} : vector<2x128xf32> to vector<2x32xf32>
    %239 = vector.extract_strided_slice %235 {offsets = [0, 96], sizes = [2, 32], strides = [1, 1]} : vector<2x128xf32> to vector<2x32xf32>
    %240 = arith.mulf %237, %203 : vector<2x32xf32>
    %241 = arith.mulf %236, %238 : vector<2x32xf32>
    %242 = arith.addf %240, %241 : vector<2x32xf32>
    %243 = math.tanh %242 : vector<2x32xf32>
    %244 = arith.mulf %239, %243 : vector<2x32xf32>
    %c5 = arith.constant 5 : index
    %c0_70 = arith.constant 0 : index
    %c0_71 = arith.constant 0 : index
    %245 = vector.load %arg7[%c5, %c0_70, %c0_71] : memref<8x2x32xf32, #tpu.memory_space<vmem>>, vector<1x2x32xf32>
    %246 = vector.shape_cast %245 : vector<1x2x32xf32> to vector<2x32xf32>
    %247 = vector.shape_cast %244 : vector<2x32xf32> to vector<1x2x32xf32>
    tpu.vector_store %arg7[%c5, %c0_70, %c0_71], %247 {strides = array<i32>} : memref<8x2x32xf32, #tpu.memory_space<vmem>>, vector<1x2x32xf32>,
    %248 = vector.extract_strided_slice %9 {offsets = [12, 0], sizes = [2, 128], strides = [1, 1]} : vector<16x128xf32> to vector<2x128xf32>
    %cst_72 = arith.constant dense<0.000000e+00> : vector<2x128xf32>
    %249 = tpu.matmul %225, %2, %cst_72 {dimension_numbers = #tpu.dot_dimension_numbers<[1], [0], [0], [1], [0, 0, 1, 1], [], []>} : vector<2x32xf32>, vector<32x128xf32>, vector<2x128xf32> -> vector<2x128xf32>
    %250 = arith.addf %248, %249 : vector<2x128xf32>
    %251 = math.tanh %250 : vector<2x128xf32>
    %cst_73 = arith.constant 5.000000e-01 : f32
    %252 = vector.broadcast %cst_73 : f32 to vector<2x128xf32>
    %253 = arith.mulf %252, %251 : vector<2x128xf32>
    %cst_74 = arith.constant 5.000000e-01 : f32
    %254 = vector.broadcast %cst_74 : f32 to vector<2x128xf32>
    %255 = arith.addf %253, %254 : vector<2x128xf32>
    %256 = vector.extract_strided_slice %255 {offsets = [0, 0], sizes = [2, 32], strides = [1, 1]} : vector<2x128xf32> to vector<2x32xf32>
    %257 = vector.extract_strided_slice %255 {offsets = [0, 32], sizes = [2, 32], strides = [1, 1]} : vector<2x128xf32> to vector<2x32xf32>
    %258 = vector.extract_strided_slice %251 {offsets = [0, 64], sizes = [2, 32], strides = [1, 1]} : vector<2x128xf32> to vector<2x32xf32>
    %259 = vector.extract_strided_slice %255 {offsets = [0, 96], sizes = [2, 32], strides = [1, 1]} : vector<2x128xf32> to vector<2x32xf32>
    %260 = arith.mulf %257, %223 : vector<2x32xf32>
    %261 = arith.mulf %256, %258 : vector<2x32xf32>
    %262 = arith.addf %260, %261 : vector<2x32xf32>
    %263 = math.tanh %262 : vector<2x32xf32>
    %264 = arith.mulf %259, %263 : vector<2x32xf32>
    %cst_75 = arith.constant dense<0.000000e+00> : vector<2x128xf32>
    %265 = tpu.matmul %264, %1, %cst_75 {dimension_numbers = #tpu.dot_dimension_numbers<[1], [0], [0], [1], [0, 0, 1, 1], [], []>} : vector<2x32xf32>, vector<32x128xf32>, vector<2x128xf32> -> vector<2x128xf32>
    %cst_76 = arith.constant dense<0.000000e+00> : vector<2x128xf32>
    %266 = tpu.matmul %244, %3, %cst_76 {dimension_numbers = #tpu.dot_dimension_numbers<[1], [0], [0], [1], [0, 0, 1, 1], [], []>} : vector<2x32xf32>, vector<32x128xf32>, vector<2x128xf32> -> vector<2x128xf32>
    %267 = arith.addf %265, %266 : vector<2x128xf32>
    %268 = vector.broadcast %5 : vector<1x128xf32> to vector<2x128xf32>
    %269 = arith.addf %267, %268 : vector<2x128xf32>
    %270 = math.tanh %269 : vector<2x128xf32>
    %cst_77 = arith.constant 5.000000e-01 : f32
    %271 = vector.broadcast %cst_77 : f32 to vector<2x128xf32>
    %272 = arith.mulf %271, %270 : vector<2x128xf32>
    %cst_78 = arith.constant 5.000000e-01 : f32
    %273 = vector.broadcast %cst_78 : f32 to vector<2x128xf32>
    %274 = arith.addf %272, %273 : vector<2x128xf32>
    %275 = vector.extract_strided_slice %274 {offsets = [0, 0], sizes = [2, 32], strides = [1, 1]} : vector<2x128xf32> to vector<2x32xf32>
    %276 = vector.extract_strided_slice %274 {offsets = [0, 32], sizes = [2, 32], strides = [1, 1]} : vector<2x128xf32> to vector<2x32xf32>
    %277 = vector.extract_strided_slice %270 {offsets = [0, 64], sizes = [2, 32], strides = [1, 1]} : vector<2x128xf32> to vector<2x32xf32>
    %278 = vector.extract_strided_slice %274 {offsets = [0, 96], sizes = [2, 32], strides = [1, 1]} : vector<2x128xf32> to vector<2x32xf32>
    %279 = arith.mulf %276, %242 : vector<2x32xf32>
    %280 = arith.mulf %275, %277 : vector<2x32xf32>
    %281 = arith.addf %279, %280 : vector<2x32xf32>
    %282 = math.tanh %281 : vector<2x32xf32>
    %283 = arith.mulf %278, %282 : vector<2x32xf32>
    %c6 = arith.constant 6 : index
    %c0_79 = arith.constant 0 : index
    %c0_80 = arith.constant 0 : index
    %284 = vector.load %arg7[%c6, %c0_79, %c0_80] : memref<8x2x32xf32, #tpu.memory_space<vmem>>, vector<1x2x32xf32>
    %285 = vector.shape_cast %284 : vector<1x2x32xf32> to vector<2x32xf32>
    %286 = vector.shape_cast %283 : vector<2x32xf32> to vector<1x2x32xf32>
    tpu.vector_store %arg7[%c6, %c0_79, %c0_80], %286 {strides = array<i32>} : memref<8x2x32xf32, #tpu.memory_space<vmem>>, vector<1x2x32xf32>,
    %287 = vector.extract_strided_slice %9 {offsets = [14, 0], sizes = [2, 128], strides = [1, 1]} : vector<16x128xf32> to vector<2x128xf32>
    %cst_81 = arith.constant dense<0.000000e+00> : vector<2x128xf32>
    %288 = tpu.matmul %264, %2, %cst_81 {dimension_numbers = #tpu.dot_dimension_numbers<[1], [0], [0], [1], [0, 0, 1, 1], [], []>} : vector<2x32xf32>, vector<32x128xf32>, vector<2x128xf32> -> vector<2x128xf32>
    %289 = arith.addf %287, %288 : vector<2x128xf32>
    %290 = math.tanh %289 : vector<2x128xf32>
    %cst_82 = arith.constant 5.000000e-01 : f32
    %291 = vector.broadcast %cst_82 : f32 to vector<2x128xf32>
    %292 = arith.mulf %291, %290 : vector<2x128xf32>
    %cst_83 = arith.constant 5.000000e-01 : f32
    %293 = vector.broadcast %cst_83 : f32 to vector<2x128xf32>
    %294 = arith.addf %292, %293 : vector<2x128xf32>
    %295 = vector.extract_strided_slice %294 {offsets = [0, 0], sizes = [2, 32], strides = [1, 1]} : vector<2x128xf32> to vector<2x32xf32>
    %296 = vector.extract_strided_slice %294 {offsets = [0, 32], sizes = [2, 32], strides = [1, 1]} : vector<2x128xf32> to vector<2x32xf32>
    %297 = vector.extract_strided_slice %290 {offsets = [0, 64], sizes = [2, 32], strides = [1, 1]} : vector<2x128xf32> to vector<2x32xf32>
    %298 = vector.extract_strided_slice %294 {offsets = [0, 96], sizes = [2, 32], strides = [1, 1]} : vector<2x128xf32> to vector<2x32xf32>
    %299 = arith.mulf %296, %262 : vector<2x32xf32>
    %300 = arith.mulf %295, %297 : vector<2x32xf32>
    %301 = arith.addf %299, %300 : vector<2x32xf32>
    %302 = math.tanh %301 : vector<2x32xf32>
    %303 = arith.mulf %298, %302 : vector<2x32xf32>
    %cst_84 = arith.constant dense<0.000000e+00> : vector<2x128xf32>
    %304 = tpu.matmul %303, %1, %cst_84 {dimension_numbers = #tpu.dot_dimension_numbers<[1], [0], [0], [1], [0, 0, 1, 1], [], []>} : vector<2x32xf32>, vector<32x128xf32>, vector<2x128xf32> -> vector<2x128xf32>
    %cst_85 = arith.constant dense<0.000000e+00> : vector<2x128xf32>
    %305 = tpu.matmul %283, %3, %cst_85 {dimension_numbers = #tpu.dot_dimension_numbers<[1], [0], [0], [1], [0, 0, 1, 1], [], []>} : vector<2x32xf32>, vector<32x128xf32>, vector<2x128xf32> -> vector<2x128xf32>
    %306 = arith.addf %304, %305 : vector<2x128xf32>
    %307 = vector.broadcast %5 : vector<1x128xf32> to vector<2x128xf32>
    %308 = arith.addf %306, %307 : vector<2x128xf32>
    %309 = math.tanh %308 : vector<2x128xf32>
    %cst_86 = arith.constant 5.000000e-01 : f32
    %310 = vector.broadcast %cst_86 : f32 to vector<2x128xf32>
    %311 = arith.mulf %310, %309 : vector<2x128xf32>
    %cst_87 = arith.constant 5.000000e-01 : f32
    %312 = vector.broadcast %cst_87 : f32 to vector<2x128xf32>
    %313 = arith.addf %311, %312 : vector<2x128xf32>
    %314 = vector.extract_strided_slice %313 {offsets = [0, 0], sizes = [2, 32], strides = [1, 1]} : vector<2x128xf32> to vector<2x32xf32>
    %315 = vector.extract_strided_slice %313 {offsets = [0, 32], sizes = [2, 32], strides = [1, 1]} : vector<2x128xf32> to vector<2x32xf32>
    %316 = vector.extract_strided_slice %309 {offsets = [0, 64], sizes = [2, 32], strides = [1, 1]} : vector<2x128xf32> to vector<2x32xf32>
    %317 = vector.extract_strided_slice %313 {offsets = [0, 96], sizes = [2, 32], strides = [1, 1]} : vector<2x128xf32> to vector<2x32xf32>
    %318 = arith.mulf %315, %281 : vector<2x32xf32>
    %319 = arith.mulf %314, %316 : vector<2x32xf32>
    %320 = arith.addf %318, %319 : vector<2x32xf32>
    %321 = math.tanh %320 : vector<2x32xf32>
    %322 = arith.mulf %317, %321 : vector<2x32xf32>
    %c7 = arith.constant 7 : index
    %c0_88 = arith.constant 0 : index
    %c0_89 = arith.constant 0 : index
    %323 = vector.load %arg7[%c7, %c0_88, %c0_89] : memref<8x2x32xf32, #tpu.memory_space<vmem>>, vector<1x2x32xf32>
    %324 = vector.shape_cast %323 : vector<1x2x32xf32> to vector<2x32xf32>
    %325 = vector.shape_cast %322 : vector<2x32xf32> to vector<1x2x32xf32>
    tpu.vector_store %arg7[%c7, %c0_88, %c0_89], %325 {strides = array<i32>} : memref<8x2x32xf32, #tpu.memory_space<vmem>>, vector<1x2x32xf32>,
    return
  }
}

</mosaic_0001>

<bundles_post_ra>
// kernel: lstm_forward_pallas.1
= control target key start
LH: loop header
LB: loop body
LE: loop exit
PB: predicated region body
PF: predicated region fallthrough
CT: control target
= control target key end

     0   :  { %12 = vsyncpa [#allocation3], 0  ;;  %s1643_s0 = inlined_call_operand.vmem [shape: f32[16,16], index: 0, kind: input, shape index: {}]   ;;  %s1644_s1 = inlined_call_operand.hbm [shape: f32[16,128], index: 1, kind: input, shape index: {}]   ;;  %s1645_s2 = inlined_call_operand.vmem [shape: f32[32,128], index: 2, kind: input, shape index: {}]   ;;  %s1646_s3 = inlined_call_operand.vmem [shape: f32[1,128], index: 3, kind: input, shape index: {}]   ;;  %s1647_s4 = inlined_call_operand.hbm [shape: f32[32,128], index: 4, kind: input, shape index: {}]   ;;  %s1648_s5 = inlined_call_operand.hbm [shape: f32[32,128], index: 5, kind: input, shape index: {}]   ;;  %s1649_s6 = inlined_call_operand.vmem [shape: f32[1,128], index: 6, kind: input, shape index: {}]   ;;  %s1650_s7 = inlined_call_operand.vmem [shape: f32[8,2,32], index: 7, kind: output, shape index: {}]  }
   0x1   :  { %13 = vsyncpa [#allocation5], 0  ;;  %s37_s26 = sshll.u32 %s1647_s4, 4  ;;  %s1281_s27 = smov [#allocation4]   ;;  %s38_s26 = int_to_ptr.hbm [resolvable:$true] %s37_s26 }
   0x2   :  { %s39_s28 = sshll.u32 %s1281_s27, 4  ;;  %s20_s8 = sshll.u32 %s1644_s1, 4  ;;  %s40_s28 = int_to_ptr.vmem [resolvable:$true] %s39_s28  ;;  %s21_s8 = int_to_ptr.hbm [resolvable:$true] %s20_s8 }
   0x3   :  { %s1282_s9 = smov 128   ;;  %s1283_s10 = smov 8  }
   0x4   :  { %45 = dma.hbm_to_vmem [thread:$0]  %s38_s26, 512, %s40_s28, [#allocation5], %s1282_s9, %s1282_s9, %s1283_s10  }
   0x5   :  { %s1284_s11 = smov [#allocation2]   ;;  %s50_s15 = sshll.u32 %s1648_s5, 4  ;;  %s51_s15 = int_to_ptr.hbm [resolvable:$true] %s50_s15 }
   0x6   :  { %s22_s12 = sshll.u32 %s1284_s11, 4  ;;  %s1285_s4 = smov [#allocation6]   ;;  %s23_s12 = int_to_ptr.vmem [resolvable:$true] %s22_s12 }
   0x7   :  { %28 = dma.hbm_to_vmem [thread:$0]  %s21_s8, 256, %s23_s12, [#allocation3], %s1282_s9, %s1282_s9, %s1283_s10  }
   0x8   :  { %s52_s16 = sshll.u32 %s1285_s4, 4  ;;  %s53_s16 = int_to_ptr.vmem [resolvable:$true] %s52_s16 }
   0x9   :  { %58 = dma.hbm_to_vmem [thread:$0]  %s51_s15, 512, %s53_s16, [#allocation5], %s1282_s9, %s1282_s9, %s1283_s10  }
   0xa   :  { %1277 = dma.done.wait [#allocation3], 256  }
   0xb   :  { %1278 = vsyncadd [#allocation3], 4294967040 }
   0xc   :  { %1279 = dma.done.wait [#allocation5], 1024  }
   0xd   :  { %1280 = vsyncadd [#allocation5], 4294966272  ;;  %v1341_v0 = vld [vmem:[%s1645_s2 + $0x18] sm:$0xff]  ;;  %v74_v1 = vld [vmem:[#allocation2 + $0x8] sm:$0xff]  ;;  %vm94_vm0 = vcmask 130048   ;;  %v1286_v7 = vmov 0.0  }
   0xe   :  { %v1346_v2 = vld [vmem:[%s1645_s2 + $0x10] sm:$0xff]  ;;  %140 = vmatpush.msra.mxu1 %v1341_v0  ;;  %115 = vmatpush.msra.mxu0 %v74_v1  ;;  %v73_v3 = vld [vmem:[#allocation2] sm:$0xff]  ;;  %v1355_v5 = vld [vmem:[%s1645_s2 + $0x8] sm:$0xff]  ;;  %s1287_s26 = smov 64   ;;  %s1288_s27 = smov 32   ;;  %vm124_vm1 = vcmask 261120  }
   0xf   :  { %v89_v4 = vld [vmem:[%s1643_s0] sm:$0xff]  ;;  %v1389_v22 = vld [vmem:[#allocation6 + $0x18] sm:$0xff]  ;;  %v1399_v26 = vld [vmem:[#allocation6 + $0x8] sm:$0xff]  ;;  %vm242_vm2 = vcmask 254976  }
  0x10   :  { %141 = vmatpush.msra.mxu1 %v1346_v2  ;;  %116 = vmatpush.msra.mxu0 %v73_v3  ;;  %v1362_v6 = vld [vmem:[%s1645_s2] sm:$0xff]  ;;  %v1391_v23 = vld [vmem:[#allocation4 + $0x18] sm:$0xff]  ;;  %v1401_v27 = vld [vmem:[#allocation4 + $0x8] sm:$0xff] }
  0x11   :  { %1100 = vmatmul.msk.f32.vlgmr.msra.gmra.mxu0 %vm94_vm0, %v89_v4  ;;  %v1377_v8 = vld [vmem:[%s1646_s3] ss:$0 sm:$0xff]  ;;  %181 = vmatpush.msra.mxu2 %v1389_v22  ;;  %v1407_v28 = vld [vmem:[#allocation6] sm:$0xff]  ;;  %v90_v63 = vld [vmem:[%s1643_s0 + $0x8] sm:$0xff] }
  0x12   :  { %142 = vmatpush.msra.mxu1 %v1355_v5  ;;  %378 = vmatpush.msrb.mxu0 %v1341_v0  ;;  %v1393_v24 = vld [vmem:[#allocation6 + $0x10] sm:$0xff]  ;;  %v1409_v29 = vld [vmem:[#allocation4] sm:$0xff] }
  0x13   :  { %206 = vmatpush.msra.mxu3 %v1391_v23  ;;  %v1397_v25 = vld [vmem:[#allocation4 + $0x10] sm:$0xff]  ;;  %182 = vmatpush.msra.mxu2 %v1393_v24 }
  0x14   :  { %143 = vmatpush.msra.mxu1 %v1362_v6  ;;  %379 = vmatpush.msrb.mxu0 %v1346_v2  ;;  %v1448_v37 = vld [vmem:[%s1649_s6] ss:$0 sm:$0xff] }
  0x15   :  { %144 = vmatmul.f32.vlgmr.msra.gmra.mxu1 %v1286_v7  ;;  %207 = vmatpush.msra.mxu3 %v1397_v25 }
  0x16   :  { %256 = vmatpush.msrb.mxu1 %v1341_v0  ;;  %380 = vmatpush.msrb.mxu0 %v1355_v5 }
  0x17   :  { %183 = vmatpush.msra.mxu2 %v1399_v26  ;;  %208 = vmatpush.msra.mxu3 %v1401_v27 }
  0x18   :  { %257 = vmatpush.msrb.mxu1 %v1346_v2  ;;  %381 = vmatpush.msrb.mxu0 %v1362_v6 }
  0x19   :  { %184 = vmatpush.msra.mxu2 %v1407_v28  ;;  %209 = vmatpush.msra.mxu3 %v1409_v29 }
  0x1a   :  { %258 = vmatpush.msrb.mxu1 %v1355_v5  ;;  %549 = vmatpush.msra.mxu0 %v1389_v22 }
  0x1b   :  { %185 = vmatmul.f32.vlgmr.msra.gmra.mxu2 %v1286_v7  ;;  %331 = vmatpush.msrb.mxu3 %v1391_v23 }
  0x1c   :  { %259 = vmatpush.msrb.mxu1 %v1362_v6  ;;  %550 = vmatpush.msra.mxu0 %v1393_v24 }
  0x1d   :  { %305 = vmatpush.msrb.mxu2 %v1389_v22  ;;  %332 = vmatpush.msrb.mxu3 %v1397_v25 }
  0x1e   :  { %427 = vmatpush.msra.mxu1 %v1389_v22  ;;  %551 = vmatpush.msra.mxu0 %v1399_v26 }
  0x1f   :  { %306 = vmatpush.msrb.mxu2 %v1393_v24  ;;  %333 = vmatpush.msrb.mxu3 %v1401_v27 }
  0x20   :  { %428 = vmatpush.msra.mxu1 %v1393_v24  ;;  %552 = vmatpush.msra.mxu0 %v1407_v28 }
  0x21   :  { %307 = vmatpush.msrb.mxu2 %v1399_v26  ;;  %334 = vmatpush.msrb.mxu3 %v1409_v29 }
  0x22   :  { %429 = vmatpush.msra.mxu1 %v1399_v26  ;;  %1101 = vmatmul.msk.f32.gmra.mxu0 %vm94_vm0, %v90_v63 }
  0x23   :  { %308 = vmatpush.msrb.mxu2 %v1407_v28 }
  0x24   :  { %430 = vmatpush.msra.mxu1 %v1407_v28 }
  0x25   :  { %453 = vmatpush.msra.mxu2 %v1391_v23 }
  0x27   :  { %454 = vmatpush.msra.mxu2 %v1397_v25 }
  0x29   :  { %455 = vmatpush.msra.mxu2 %v1401_v27 }
  0x2b   :  { %456 = vmatpush.msra.mxu2 %v1409_v29 }
  0x8e   :  { %v118_v9 = vpop.f32.mrf.mxu0 }
  0x8f   :  { %v1380_v10 = vadd.f32 %v1377_v8, %v118_v9 }
  0x92   :  { %v145_v11 = vpop.f32.mrf.mxu1 }
  0x93   :  { %v148_v12 = vadd.f32 %v145_v11, %v1380_v10 }
  0x95   :  { %1141 = vtanh.f32 %v148_v12 }
  0x9b   :  { %v1142_v13 = vpop.eup %1141 }
  0x9c   :  { %154 = vrot.lane.b32.xlu0 %v1142_v13, %s1287_s26  ;;  %v150_v14 = vmul.f32 0.5, %v1142_v13 }
  0x9e   :  { %v151_v15 = vadd.f32 0.5, %v150_v14  ;;  %v186_v36 = vpop.f32.mrf.mxu2 }
  0x9f   :  { %v1489_v9 = vpop.f32.mrf.mxu0 }
  0xa0   :  { %v152_v18 = vmul.f32 0.0, %v151_v15 }
 0x10e   :  { %v155_v16 = vpop.permute.xlu0 %154 }
 0x10f   :  { %v157_v17 = vmul.f32 %v155_v16, %v151_v15 }
 0x111   :  { %159 = vrot.lane.b32.xlu0 %v157_v17, %s1288_s27 }
 0x183   :  { %v160_v19 = vpop.permute.xlu0 %159 }
 0x184   :  { %v1385_v20 = vadd.f32 %v160_v19, %v152_v18 }
 0x186   :  { %1143 = vtanh.f32 %v1385_v20  ;;  %v272_v51 = vrot.slane %v1385_v20, 6 }
 0x18c   :  { %v1144_v21 = vpop.eup %1143 }
 0x18d   :  { %165 = vrot.lane.b32.xlu1 %v1144_v21, %s1287_s26 }
 0x1ff   :  { %v166_v30 = vpop.permute.xlu1 %165 }
 0x200   :  { %v168_v31 = vmul.f32 %v166_v30, %v151_v15 }
 0x202   :  { %190 = vrot.lane.b32.xlu1 %v168_v31, %s1288_s27 }
 0x274   :  { %v191_v32 = vpop.permute.xlu1 %190 }
 0x275   :  { %1102 = vmatmul.msk.f32.vlgmr.msra.gmra.mxu3 %vm124_vm1, %v191_v32  ;;  %1103 = vmatmul.msk.f32.vlgmr.msrb.gmra.mxu1 %vm124_vm1, %v191_v32 }
 0x276   :  { %500 = vmatpush.msra.mxu3 %v1341_v0  ;;  %575 = vmatpush.msrb.mxu1 %v1391_v23 }
 0x278   :  { %501 = vmatpush.msra.mxu3 %v1346_v2  ;;  %576 = vmatpush.msrb.mxu1 %v1397_v25 }
 0x27a   :  { %502 = vmatpush.msra.mxu3 %v1355_v5  ;;  %577 = vmatpush.msrb.mxu1 %v1401_v27 }
 0x27c   :  { %503 = vmatpush.msra.mxu3 %v1362_v6  ;;  %578 = vmatpush.msrb.mxu1 %v1409_v29 }
 0x2f2   :  { %v261_v33 = vpop.f32.mrf.mxu1 }
 0x2f3   :  { %v265_v34 = vrot.slane %v261_v33, 6 }
 0x2f5   :  { %v267_v35 = vadd.f32 %v265_v34, %v1380_v10 }
 0x2f7   :  { %1145 = vtanh.f32 %v267_v35 }
 0x2f8   :  { %v211_v38 = vpop.f32.mrf.mxu3 }
 0x2f9   :  { %v212_v39 = vadd.f32 %v211_v38, %v186_v36 }
 0x2fb   :  { %v217_v40 = vadd.f32 %v1448_v37, %v212_v39 }
 0x2fd   :  { %v1146_v41 = vpop.eup %1145  ;;  %1147 = vtanh.f32 %v217_v40 }
 0x2fe   :  { %276 = vrot.lane.b32.xlu2 %v1146_v41, %s1287_s26  ;;  %v269_v43 = vmul.f32 0.5, %v1146_v41 }
 0x300   :  { %v270_v44 = vadd.f32 0.5, %v269_v43 }
 0x302   :  { %v274_v52 = vmul.f32 %v272_v51, %v270_v44 }
 0x303   :  { %v1148_v42 = vpop.eup %1147 }
 0x304   :  { %v219_v47 = vmul.f32 0.5, %v1148_v42 }
 0x306   :  { %223 = vrot.lane.b32.xlu2 %v1148_v42, %s1287_s26  ;;  %v220_v48 = vadd.f32 0.5, %v219_v47 }
 0x308   :  { %v221_v55 = vmul.f32 0.0, %v220_v48 }
 0x358   :  { %v277_v45 = vpop.permute.xlu2 %276 }
 0x359   :  { %v279_v46 = vmul.f32 %v277_v45, %v270_v44 }
 0x35b   :  { %281 = vrot.lane.b32.xlu0 %v279_v46, %s1288_s27 }
 0x360   :  { %v224_v49 = vpop.permute.xlu2 %223 }
 0x361   :  { %v226_v50 = vmul.f32 %v224_v49, %v220_v48 }
 0x363   :  { %228 = vrot.lane.b32.xlu1 %v226_v50, %s1288_s27 }
 0x3cd   :  { %v282_v53 = vpop.permute.xlu0 %281 }
 0x3ce   :  { %v1456_v54 = vadd.f32 %v282_v53, %v274_v52 }
 0x3d0   :  { %1149 = vtanh.f32 %v1456_v54  ;;  %v394_v36 = vrot.slane %v1456_v54, 6 }
 0x3d5   :  { %v229_v56 = vpop.permute.xlu1 %228 }
 0x3d6   :  { %v1150_v57 = vpop.eup %1149  ;;  %v1459_v58 = vadd.f32 %v229_v56, %v221_v55 }
 0x3d7   :  { %287 = vrot.lane.b32.xlu2 %v1150_v57, %s1287_s26 }
 0x3d8   :  { %1151 = vtanh.f32 %v1459_v58 }
 0x3de   :  { %v1152_v59 = vpop.eup %1151 }
 0x3df   :  { %234 = vrot.lane.b32.xlu0 %v1152_v59, %s1287_s26 }
 0x431   :  { %v288_v60 = vpop.permute.xlu2 %287 }
 0x432   :  { %v290_v61 = vmul.f32 %v288_v60, %v270_v44 }
 0x434   :  { %v314_v62 = vrot.slane %v290_v61, 2 }
 0x436   :  { %315 = vrot.lane.b32.xlu1 %v314_v62, %s1288_s27 }
 0x451   :  { %v235_v1 = vpop.permute.xlu0 %234 }
 0x452   :  { %v237_v3 = vmul.f32 %v235_v1, %v220_v48 }
 0x454   :  { %239 = vrot.lane.b32.xlu2 %v237_v3, %s1288_s27 }
 0x4a8   :  { %v316_v4 = vpop.permute.xlu1 %315 }
 0x4a9   :  { %1105 = vmatmul.msk.f32.vlgmr.msrb.gmra.mxu3 %vm124_vm1, %v316_v4  ;;  %1107 = vmatmul.msk.f32.vlgmr.msrb.gmra.mxu0 %vm124_vm1, %v316_v4 }
 0x4aa   :  { %693 = vmatpush.msrb.mxu0 %v1391_v23  ;;  %668 = vmatpush.msrb.mxu3 %v1389_v22 }
 0x4ac   :  { %694 = vmatpush.msrb.mxu0 %v1397_v25  ;;  %669 = vmatpush.msrb.mxu3 %v1393_v24 }
 0x4ae   :  { %v240_v7 = vpop.permute.xlu2 %239  ;;  %695 = vmatpush.msrb.mxu0 %v1401_v27  ;;  %670 = vmatpush.msrb.mxu3 %v1399_v26 }
 0x4af   :  { %243 = vst.msk [vmem:[%s1650_s7] sm:$0x3] %vm242_vm2, %v240_v7  ;;  %1104 = vmatmul.msk.f32.vlgmr.msrb.gmra.mxu2 %vm124_vm1, %v240_v7 }
 0x4b0   :  { %622 = vmatpush.msrb.mxu2 %v1341_v0  ;;  %696 = vmatpush.msrb.mxu0 %v1409_v29 }
 0x4b1   :  { %671 = vmatpush.msrb.mxu3 %v1407_v28 }
 0x4b2   :  { %623 = vmatpush.msrb.mxu2 %v1346_v2 }
 0x4b4   :  { %624 = vmatpush.msrb.mxu2 %v1355_v5 }
 0x4b6   :  { %625 = vmatpush.msrb.mxu2 %v1362_v6 }
 0x526   :  { %v383_v11 = vpop.f32.mrf.mxu0 }
 0x527   :  { %v387_v12 = vrot.slane %v383_v11, 4 }
 0x529   :  { %v389_v13 = vadd.f32 %v387_v12, %v1380_v10 }
 0x52b   :  { %1153 = vtanh.f32 %v389_v13 }
 0x52c   :  { %v336_v15 = vpop.f32.mrf.mxu3 }
 0x531   :  { %v1154_v14 = vpop.eup %1153 }
 0x532   :  { %398 = vrot.lane.b32.xlu0 %v1154_v14, %s1287_s26  ;;  %v310_v16 = vpop.f32.mrf.mxu2  ;;  %v391_v20 = vmul.f32 0.5, %v1154_v14 }
 0x533   :  { %v337_v17 = vadd.f32 %v336_v15, %v310_v16 }
 0x534   :  { %v392_v21 = vadd.f32 0.5, %v391_v20 }
 0x535   :  { %v339_v18 = vadd.f32 %v1448_v37, %v337_v17 }
 0x536   :  { %v396_v38 = vmul.f32 %v394_v36, %v392_v21  ;;  %v1553_v36 = vadd.f32 %v1377_v8, %v1489_v9 }
 0x537   :  { %1155 = vtanh.f32 %v339_v18 }
 0x53d   :  { %v1156_v19 = vpop.eup %1155 }
 0x53e   :  { %345 = vrot.lane.b32.xlu1 %v1156_v19, %s1287_s26  ;;  %v341_v32 = vmul.f32 0.5, %v1156_v19 }
 0x540   :  { %v342_v33 = vadd.f32 0.5, %v341_v32 }
 0x542   :  { %v343_v42 = vmul.f32 %v342_v33, %v1459_v58 }
 0x5a4   :  { %v399_v30 = vpop.permute.xlu0 %398 }
 0x5a5   :  { %v401_v31 = vmul.f32 %v399_v30, %v392_v21 }
 0x5a7   :  { %403 = vrot.lane.b32.xlu2 %v401_v31, %s1288_s27 }
 0x5b0   :  { %v346_v34 = vpop.permute.xlu1 %345 }
 0x5b1   :  { %v348_v35 = vmul.f32 %v346_v34, %v342_v33 }
 0x5b3   :  { %350 = vrot.lane.b32.xlu0 %v348_v35, %s1288_s27 }
 0x601   :  { %v404_v39 = vpop.permute.xlu2 %403 }
 0x602   :  { %v406_v40 = vadd.f32 %v404_v39, %v396_v38 }
 0x604   :  { %1157 = vtanh.f32 %v406_v40  ;;  %v516_v12 = vrot.slane %v406_v40, 6 }
 0x60a   :  { %v1158_v41 = vpop.eup %1157 }
 0x60b   :  { %409 = vrot.lane.b32.xlu1 %v1158_v41, %s1287_s26 }
 0x625   :  { %v351_v43 = vpop.permute.xlu0 %350 }
 0x626   :  { %v353_v44 = vadd.f32 %v351_v43, %v343_v42 }
 0x628   :  { %1159 = vtanh.f32 %v353_v44 }
 0x62e   :  { %v1160_v45 = vpop.eup %1159 }
 0x62f   :  { %356 = vrot.lane.b32.xlu2 %v1160_v45, %s1287_s26 }
 0x67d   :  { %v410_v46 = vpop.permute.xlu1 %409 }
 0x67e   :  { %v412_v47 = vmul.f32 %v410_v46, %v392_v21 }
 0x680   :  { %v436_v48 = vrot.slane %v412_v47, 4 }
 0x682   :  { %437 = vrot.lane.b32.xlu0 %v436_v48, %s1288_s27 }
 0x689   :  { %v357_v49 = vpop.permute.xlu2 %356 }
 0x68a   :  { %v359_v50 = vmul.f32 %v357_v49, %v342_v33 }
 0x68c   :  { %361 = vrot.lane.b32.xlu1 %v359_v50, %s1288_s27 }
 0x6f4   :  { %v438_v51 = vpop.permute.xlu0 %437 }
 0x6f5   :  { %1109 = vmatmul.msk.f32.vlgmr.msra.gmra.mxu2 %vm124_vm1, %v438_v51  ;;  %1111 = vmatmul.msk.f32.vlgmr.msra.gmra.mxu3 %vm124_vm1, %v438_v51 }
 0x6f6   :  { %815 = vmatpush.msra.mxu3 %v1391_v23  ;;  %789 = vmatpush.msra.mxu2 %v1389_v22 }
 0x6f8   :  { %816 = vmatpush.msra.mxu3 %v1397_v25  ;;  %790 = vmatpush.msra.mxu2 %v1393_v24 }
 0x6fa   :  { %817 = vmatpush.msra.mxu3 %v1401_v27  ;;  %791 = vmatpush.msra.mxu2 %v1399_v26 }
 0x6fc   :  { %818 = vmatpush.msra.mxu3 %v1409_v29  ;;  %792 = vmatpush.msra.mxu2 %v1407_v28 }
 0x6fe   :  { %v362_v52 = vpop.permute.xlu1 %361 }
 0x6ff   :  { %1106 = vst.msk [vmem:[%s1650_s7 + $0x2] sm:$0x3] %vm242_vm2, %v362_v52  ;;  %1108 = vmatmul.msk.f32.vlgmr.msra.gmra.mxu1 %vm124_vm1, %v362_v52 }
 0x700   :  { %740 = vmatpush.msra.mxu1 %v1341_v0 }
 0x702   :  { %741 = vmatpush.msra.mxu1 %v1346_v2 }
 0x704   :  { %742 = vmatpush.msra.mxu1 %v1355_v5 }
 0x706   :  { %743 = vmatpush.msra.mxu1 %v1362_v6 }
 0x778   :  { %v505_v53 = vpop.f32.mrf.mxu3  ;;  %v458_v56 = vpop.f32.mrf.mxu2 }
 0x779   :  { %v509_v54 = vrot.slane %v505_v53, 2 }
 0x77b   :  { %v511_v55 = vadd.f32 %v509_v54, %v1380_v10 }
 0x77c   :  { %v432_v57 = vpop.f32.mrf.mxu1 }
 0x77d   :  { %1161 = vtanh.f32 %v511_v55  ;;  %v459_v58 = vadd.f32 %v458_v56, %v432_v57 }
 0x77f   :  { %v461_v59 = vadd.f32 %v1448_v37, %v459_v58 }
 0x781   :  { %1163 = vtanh.f32 %v461_v59 }
 0x783   :  { %v1162_v60 = vpop.eup %1161 }
 0x784   :  { %520 = vrot.lane.b32.xlu2 %v1162_v60, %s1287_s26  ;;  %v513_v62 = vmul.f32 0.5, %v1162_v60 }
 0x786   :  { %v514_v63 = vadd.f32 0.5, %v513_v62 }
 0x787   :  { %v1164_v61 = vpop.eup %1163 }
 0x788   :  { %467 = vrot.lane.b32.xlu0 %v1164_v61, %s1287_s26  ;;  %v463_v10 = vmul.f32 0.5, %v1164_v61  ;;  %v518_v13 = vmul.f32 %v516_v12, %v514_v63 }
 0x78a   :  { %v464_v4 = vadd.f32 0.5, %v463_v10 }
 0x78c   :  { %v465_v16 = vmul.f32 %v464_v4, %v353_v44 }
 0x7de   :  { %v521_v1 = vpop.permute.xlu2 %520 }
 0x7df   :  { %v523_v3 = vmul.f32 %v521_v1, %v514_v63 }
 0x7e1   :  { %525 = vrot.lane.b32.xlu1 %v523_v3, %s1288_s27 }
 0x7fa   :  { %v468_v7 = vpop.permute.xlu0 %467 }
 0x7fb   :  { %v470_v11 = vmul.f32 %v468_v7, %v464_v4 }
 0x7fd   :  { %472 = vrot.lane.b32.xlu2 %v470_v11, %s1288_s27 }
 0x853   :  { %v526_v14 = vpop.permute.xlu1 %525 }
 0x854   :  { %v528_v15 = vadd.f32 %v526_v14, %v518_v13 }
 0x856   :  { %1165 = vtanh.f32 %v528_v15  ;;  %v635_v52 = vrot.slane %v528_v15, 6 }
 0x857   :  { %v473_v17 = vpop.permute.xlu2 %472 }
 0x858   :  { %v475_v18 = vadd.f32 %v473_v17, %v465_v16 }
 0x85a   :  { %1167 = vtanh.f32 %v475_v18 }
 0x85c   :  { %v1166_v19 = vpop.eup %1165 }
 0x85d   :  { %531 = vrot.lane.b32.xlu0 %v1166_v19, %s1287_s26 }
 0x860   :  { %v1168_v20 = vpop.eup %1167 }
 0x861   :  { %478 = vrot.lane.b32.xlu1 %v1168_v20, %s1287_s26 }
 0x8cf   :  { %v532_v21 = vpop.permute.xlu0 %531 }
 0x8d0   :  { %v534_v30 = vmul.f32 %v532_v21, %v514_v63 }
 0x8d2   :  { %v558_v31 = vrot.slane %v534_v30, 6 }
 0x8d3   :  { %v479_v32 = vpop.permute.xlu1 %478 }
 0x8d4   :  { %v481_v33 = vmul.f32 %v479_v32, %v464_v4  ;;  %559 = vrot.lane.b32.xlu2 %v558_v31, %s1288_s27 }
 0x8d6   :  { %483 = vrot.lane.b32.xlu0 %v481_v33, %s1288_s27 }
 0x92e   :  { %v560_v34 = vpop.permute.xlu2 %559 }
 0x92f   :  { %1113 = vmatmul.msk.f32.vlgmr.msrb.gmra.mxu1 %vm124_vm1, %v560_v34  ;;  %1115 = vmatmul.msk.f32.vlgmr.msrb.gmra.mxu2 %vm124_vm1, %v560_v34 }
 0x930   :  { %937 = vmatpush.msrb.mxu2 %v1391_v23  ;;  %911 = vmatpush.msrb.mxu1 %v1389_v22 }
 0x932   :  { %938 = vmatpush.msrb.mxu2 %v1397_v25  ;;  %912 = vmatpush.msrb.mxu1 %v1393_v24 }
 0x934   :  { %939 = vmatpush.msrb.mxu2 %v1401_v27  ;;  %913 = vmatpush.msrb.mxu1 %v1399_v26 }
 0x936   :  { %940 = vmatpush.msrb.mxu2 %v1409_v29  ;;  %914 = vmatpush.msrb.mxu1 %v1407_v28 }
 0x948   :  { %v484_v35 = vpop.permute.xlu0 %483 }
 0x949   :  { %1110 = vst.msk [vmem:[%s1650_s7 + $0x4] sm:$0x3] %vm242_vm2, %v484_v35  ;;  %1112 = vmatmul.msk.f32.vlgmr.msra.gmra.mxu0 %vm124_vm1, %v484_v35 }
 0x94a   :  { %862 = vmatpush.msra.mxu0 %v1341_v0 }
 0x94c   :  { %863 = vmatpush.msra.mxu0 %v1346_v2 }
 0x94e   :  { %864 = vmatpush.msra.mxu0 %v1355_v5 }
 0x950   :  { %865 = vmatpush.msra.mxu0 %v1362_v6 }
 0x9ac   :  { %v580_v41 = vpop.f32.mrf.mxu1 }
 0x9b2   :  { %v627_v38 = vpop.f32.mrf.mxu2 }
 0x9b3   :  { %v630_v39 = vadd.f32 %v627_v38, %v1553_v36 }
 0x9b5   :  { %1169 = vtanh.f32 %v630_v39 }
 0x9bb   :  { %v1170_v40 = vpop.eup %1169 }
 0x9bc   :  { %639 = vrot.lane.b32.xlu2 %v1170_v40, %s1287_s26  ;;  %v632_v46 = vmul.f32 0.5, %v1170_v40 }
 0x9be   :  { %v633_v47 = vadd.f32 0.5, %v632_v46 }
 0x9c0   :  { %v637_v53 = vmul.f32 %v635_v52, %v633_v47 }
 0x9c6   :  { %v554_v42 = vpop.f32.mrf.mxu0 }
 0x9c7   :  { %v581_v43 = vadd.f32 %v580_v41, %v554_v42 }
 0x9c9   :  { %v583_v44 = vadd.f32 %v1448_v37, %v581_v43 }
 0x9cb   :  { %1171 = vtanh.f32 %v583_v44 }
 0x9d1   :  { %v1172_v45 = vpop.eup %1171 }
 0x9d2   :  { %589 = vrot.lane.b32.xlu1 %v1172_v45, %s1287_s26  ;;  %v585_v48 = vmul.f32 0.5, %v1172_v45 }
 0x9d4   :  { %v586_v49 = vadd.f32 0.5, %v585_v48 }
 0x9d6   :  { %v587_v57 = vmul.f32 %v586_v49, %v475_v18 }
 0xa16   :  { %v640_v8 = vpop.permute.xlu2 %639 }
 0xa17   :  { %v642_v9 = vmul.f32 %v640_v8, %v633_v47 }
 0xa19   :  { %644 = vrot.lane.b32.xlu1 %v642_v9, %s1288_s27 }
 0xa44   :  { %v590_v50 = vpop.permute.xlu1 %589 }
 0xa45   :  { %v592_v51 = vmul.f32 %v590_v50, %v586_v49 }
 0xa47   :  { %594 = vrot.lane.b32.xlu0 %v592_v51, %s1288_s27 }
 0xa8b   :  { %v645_v54 = vpop.permute.xlu1 %644 }
 0xa8c   :  { %v647_v55 = vadd.f32 %v645_v54, %v637_v53 }
 0xa8e   :  { %1173 = vtanh.f32 %v647_v55  ;;  %v756_v14 = vrot.slane %v647_v55, 6 }
 0xa94   :  { %v1174_v56 = vpop.eup %1173 }
 0xa95   :  { %650 = vrot.lane.b32.xlu0 %v1174_v56, %s1287_s26 }
 0xab9   :  { %v595_v58 = vpop.permute.xlu0 %594 }
 0xaba   :  { %v597_v59 = vadd.f32 %v595_v58, %v587_v57 }
 0xabc   :  { %1175 = vtanh.f32 %v597_v59 }
 0xac2   :  { %v1176_v60 = vpop.eup %1175 }
 0xac3   :  { %600 = vrot.lane.b32.xlu2 %v1176_v60, %s1287_s26 }
 0xb07   :  { %v651_v61 = vpop.permute.xlu0 %650 }
 0xb08   :  { %v653_v62 = vmul.f32 %v651_v61, %v633_v47 }
 0xb0a   :  { %677 = vrot.lane.b32.xlu2 %v653_v62, %s1288_s27 }
 0xb1d   :  { %v601_v63 = vpop.permute.xlu2 %600 }
 0xb1e   :  { %v603_v1 = vmul.f32 %v601_v63, %v586_v49 }
 0xb20   :  { %605 = vrot.lane.b32.xlu1 %v603_v1, %s1288_s27 }
 0xb64   :  { %v678_v3 = vpop.permute.xlu2 %677 }
 0xb65   :  { %1117 = vmatmul.msk.f32.vlgmr.msrb.gmra.mxu0 %vm124_vm1, %v678_v3  ;;  %1119 = vmatmul.msk.f32.vlgmr.msra.gmra.mxu1 %vm124_vm1, %v678_v3 }
 0xb66   :  { %1059 = vmatpush.msra.mxu1 %v1391_v23  ;;  %1033 = vmatpush.msrb.mxu0 %v1389_v22 }
 0xb68   :  { %1060 = vmatpush.msra.mxu1 %v1397_v25  ;;  %1034 = vmatpush.msrb.mxu0 %v1393_v24 }
 0xb6a   :  { %1061 = vmatpush.msra.mxu1 %v1401_v27  ;;  %1035 = vmatpush.msrb.mxu0 %v1399_v26 }
 0xb6c   :  { %1062 = vmatpush.msra.mxu1 %v1409_v29  ;;  %1036 = vmatpush.msrb.mxu0 %v1407_v28 }
 0xb92   :  { %v606_v10 = vpop.permute.xlu1 %605 }
 0xb93   :  { %1114 = vst.msk [vmem:[%s1650_s7 + $0x6] sm:$0x3] %vm242_vm2, %v606_v10  ;;  %1116 = vmatmul.msk.f32.vlgmr.msrb.gmra.mxu3 %vm124_vm1, %v606_v10 }
 0xb94   :  { %984 = vmatpush.msrb.mxu3 %v1341_v0 }
 0xb96   :  { %985 = vmatpush.msrb.mxu3 %v1346_v2 }
 0xb98   :  { %986 = vmatpush.msrb.mxu3 %v1355_v5 }
 0xb9a   :  { %987 = vmatpush.msrb.mxu3 %v1362_v6 }
 0xbe2   :  { %v745_v22 = vpop.f32.mrf.mxu1  ;;  %v698_v26 = vpop.f32.mrf.mxu0 }
 0xbe3   :  { %v749_v23 = vrot.slane %v745_v22, 6 }
 0xbe5   :  { %v751_v24 = vadd.f32 %v749_v23, %v1553_v36 }
 0xbe7   :  { %1177 = vtanh.f32 %v751_v24 }
 0xbed   :  { %v1178_v25 = vpop.eup %1177 }
 0xbee   :  { %760 = vrot.lane.b32.xlu0 %v1178_v25, %s1287_s26  ;;  %v753_v2 = vmul.f32 0.5, %v1178_v25 }
 0xbf0   :  { %v754_v5 = vadd.f32 0.5, %v753_v2 }
 0xbf2   :  { %v758_v15 = vmul.f32 %v756_v14, %v754_v5 }
 0xc16   :  { %v673_v27 = vpop.f32.mrf.mxu3 }
 0xc17   :  { %v699_v28 = vadd.f32 %v698_v26, %v673_v27 }
 0xc19   :  { %v701_v29 = vadd.f32 %v1448_v37, %v699_v28 }
 0xc1b   :  { %1179 = vtanh.f32 %v701_v29 }
 0xc21   :  { %v1180_v0 = vpop.eup %1179 }
 0xc22   :  { %707 = vrot.lane.b32.xlu1 %v1180_v0, %s1287_s26  ;;  %v703_v7 = vmul.f32 0.5, %v1180_v0 }
 0xc24   :  { %v704_v11 = vadd.f32 0.5, %v703_v7 }
 0xc26   :  { %v705_v19 = vmul.f32 %v704_v11, %v597_v59 }
 0xc60   :  { %v761_v6 = vpop.permute.xlu0 %760 }
 0xc61   :  { %v763_v4 = vmul.f32 %v761_v6, %v754_v5 }
 0xc63   :  { %765 = vrot.lane.b32.xlu2 %v763_v4, %s1288_s27 }
 0xc94   :  { %v708_v12 = vpop.permute.xlu1 %707 }
 0xc95   :  { %v710_v13 = vmul.f32 %v708_v12, %v704_v11 }
 0xc97   :  { %712 = vrot.lane.b32.xlu0 %v710_v13, %s1288_s27 }
 0xcbd   :  { %v766_v16 = vpop.permute.xlu2 %765 }
 0xcbe   :  { %v768_v17 = vadd.f32 %v766_v16, %v758_v15 }
 0xcc0   :  { %1181 = vtanh.f32 %v768_v17  ;;  %v878_v55 = vrot.slane %v768_v17, 6 }
 0xcc6   :  { %v1182_v18 = vpop.eup %1181 }
 0xcc7   :  { %771 = vrot.lane.b32.xlu1 %v1182_v18, %s1287_s26 }
 0xd09   :  { %v713_v20 = vpop.permute.xlu0 %712 }
 0xd0a   :  { %v715_v21 = vadd.f32 %v713_v20, %v705_v19 }
 0xd0c   :  { %1183 = vtanh.f32 %v715_v21 }
 0xd12   :  { %v1184_v30 = vpop.eup %1183 }
 0xd13   :  { %718 = vrot.lane.b32.xlu2 %v1184_v30, %s1287_s26 }
 0xd39   :  { %v772_v31 = vpop.permute.xlu1 %771 }
 0xd3a   :  { %v774_v32 = vmul.f32 %v772_v31, %v754_v5 }
 0xd3c   :  { %v798_v33 = vrot.slane %v774_v32, 2 }
 0xd3e   :  { %799 = vrot.lane.b32.xlu0 %v798_v33, %s1288_s27 }
 0xd6d   :  { %v719_v34 = vpop.permute.xlu2 %718 }
 0xd6e   :  { %v721_v35 = vmul.f32 %v719_v34, %v704_v11 }
 0xd70   :  { %723 = vrot.lane.b32.xlu1 %v721_v35, %s1288_s27 }
 0xdb0   :  { %v800_v38 = vpop.permute.xlu0 %799 }
 0xdb1   :  { %1121 = vmatmul.msk.f32.vlgmr.msra.gmra.mxu3 %vm124_vm1, %v800_v38  ;;  %1123 = vmatmul.msk.f32.vlgmr.msra.gmra.mxu0 %vm124_vm1, %v800_v38 }
 0xde2   :  { %v724_v39 = vpop.permute.xlu1 %723 }
 0xde3   :  { %1118 = vst.msk [vmem:[%s1650_s7 + $0x8] sm:$0x3] %vm242_vm2, %v724_v39  ;;  %1120 = vmatmul.msk.f32.vlgmr.msra.gmra.mxu2 %vm124_vm1, %v724_v39 }
 0xe2e   :  { %v867_v40 = vpop.f32.mrf.mxu0 }
 0xe2f   :  { %v871_v41 = vrot.slane %v867_v40, 4 }
 0xe31   :  { %v873_v42 = vadd.f32 %v871_v41, %v1553_v36 }
 0xe33   :  { %1185 = vtanh.f32 %v873_v42 }
 0xe34   :  { %v820_v44 = vpop.f32.mrf.mxu3 }
 0xe39   :  { %v1186_v43 = vpop.eup %1185 }
 0xe3a   :  { %882 = vrot.lane.b32.xlu2 %v1186_v43, %s1287_s26  ;;  %v875_v9 = vmul.f32 0.5, %v1186_v43 }
 0xe3c   :  { %v876_v48 = vadd.f32 0.5, %v875_v9 }
 0xe3e   :  { %v880_v56 = vmul.f32 %v878_v55, %v876_v48 }
 0xe66   :  { %v794_v45 = vpop.f32.mrf.mxu2 }
 0xe67   :  { %v821_v46 = vadd.f32 %v820_v44, %v794_v45 }
 0xe69   :  { %v823_v47 = vadd.f32 %v1448_v37, %v821_v46 }
 0xe6b   :  { %1187 = vtanh.f32 %v823_v47 }
 0xe71   :  { %v1188_v8 = vpop.eup %1187 }
 0xe72   :  { %829 = vrot.lane.b32.xlu0 %v1188_v8, %s1287_s26  ;;  %v825_v51 = vmul.f32 0.5, %v1188_v8 }
 0xe74   :  { %v826_v52 = vadd.f32 0.5, %v825_v51 }
 0xe76   :  { %v827_v60 = vmul.f32 %v826_v52, %v715_v21 }
 0xe94   :  { %v883_v49 = vpop.permute.xlu2 %882 }
 0xe95   :  { %v885_v50 = vmul.f32 %v883_v49, %v876_v48 }
 0xe97   :  { %887 = vrot.lane.b32.xlu1 %v885_v50, %s1288_s27 }
 0xee4   :  { %v830_v53 = vpop.permute.xlu0 %829 }
 0xee5   :  { %v832_v54 = vmul.f32 %v830_v53, %v826_v52 }
 0xee7   :  { %834 = vrot.lane.b32.xlu2 %v832_v54, %s1288_s27 }
 0xf09   :  { %v888_v57 = vpop.permute.xlu1 %887 }
 0xf0a   :  { %v890_v58 = vadd.f32 %v888_v57, %v880_v56 }
 0xf0c   :  { %1189 = vtanh.f32 %v890_v58  ;;  %v1000_v17 = vrot.slane %v890_v58, 6 }
 0xf12   :  { %v1190_v59 = vpop.eup %1189 }
 0xf13   :  { %893 = vrot.lane.b32.xlu0 %v1190_v59, %s1287_s26 }
 0xf41   :  { %v835_v61 = vpop.permute.xlu2 %834 }
 0xf42   :  { %v837_v62 = vadd.f32 %v835_v61, %v827_v60 }
 0xf44   :  { %1191 = vtanh.f32 %v837_v62 }
 0xf4a   :  { %v1192_v63 = vpop.eup %1191 }
 0xf4b   :  { %840 = vrot.lane.b32.xlu1 %v1192_v63, %s1287_s26 }
 0xf85   :  { %v894_v1 = vpop.permute.xlu0 %893 }
 0xf86   :  { %v896_v3 = vmul.f32 %v894_v1, %v876_v48 }
 0xf88   :  { %v920_v10 = vrot.slane %v896_v3, 4 }
 0xf8a   :  { %921 = vrot.lane.b32.xlu2 %v920_v10, %s1288_s27 }
 0xfbd   :  { %v841_v22 = vpop.permute.xlu1 %840 }
 0xfbe   :  { %v843_v23 = vmul.f32 %v841_v22, %v826_v52 }
 0xfc0   :  { %845 = vrot.lane.b32.xlu0 %v843_v23, %s1288_s27 }
 0xfe4   :  { %v922_v24 = vpop.permute.xlu2 %921 }
 0xfe5   :  { %1125 = vmatmul.msk.f32.vlgmr.msrb.gmra.mxu2 %vm124_vm1, %v922_v24  ;;  %1127 = vmatmul.msk.f32.vlgmr.msrb.gmra.mxu3 %vm124_vm1, %v922_v24 }
0x1032   :  { %v846_v25 = vpop.permute.xlu0 %845 }
0x1033   :  { %1122 = vst.msk [vmem:[%s1650_s7 + $0xa] sm:$0x3] %vm242_vm2, %v846_v25  ;;  %1124 = vmatmul.msk.f32.vlgmr.msrb.gmra.mxu1 %vm124_vm1, %v846_v25 }
0x1068   :  { %v989_v26 = vpop.f32.mrf.mxu3  ;;  %v942_v0 = vpop.f32.mrf.mxu2 }
0x1069   :  { %v993_v27 = vrot.slane %v989_v26, 2 }
0x106b   :  { %v995_v28 = vadd.f32 %v993_v27, %v1553_v36 }
0x106d   :  { %1193 = vtanh.f32 %v995_v28 }
0x1073   :  { %v1194_v29 = vpop.eup %1193 }
0x1074   :  { %1004 = vrot.lane.b32.xlu1 %v1194_v29, %s1287_s26  ;;  %v997_v7 = vmul.f32 0.5, %v1194_v29 }
0x1076   :  { %v998_v11 = vadd.f32 0.5, %v997_v7 }
0x1078   :  { %v1002_v18 = vmul.f32 %v1000_v17, %v998_v11 }
0x10b0   :  { %v916_v2 = vpop.f32.mrf.mxu1 }
0x10b1   :  { %v943_v5 = vadd.f32 %v942_v0, %v916_v2 }
0x10b3   :  { %v945_v6 = vadd.f32 %v1448_v37, %v943_v5 }
0x10b5   :  { %1195 = vtanh.f32 %v945_v6 }
0x10bb   :  { %v1196_v4 = vpop.eup %1195 }
0x10bc   :  { %951 = vrot.lane.b32.xlu2 %v1196_v4, %s1287_s26  ;;  %v947_v36 = vmul.f32 0.5, %v1196_v4 }
0x10be   :  { %v948_v14 = vadd.f32 0.5, %v947_v36 }
0x10c0   :  { %v949_v30 = vmul.f32 %v948_v14, %v837_v62 }
0x10e6   :  { %v1005_v12 = vpop.permute.xlu1 %1004 }
0x10e7   :  { %v1007_v13 = vmul.f32 %v1005_v12, %v998_v11 }
0x10e9   :  { %1009 = vrot.lane.b32.xlu0 %v1007_v13, %s1288_s27 }
0x1116   :  { %v952_v15 = vpop.permute.xlu2 %951 }
0x1117   :  { %v954_v16 = vmul.f32 %v952_v15, %v948_v14 }
0x1119   :  { %956 = vrot.lane.b32.xlu1 %v954_v16, %s1288_s27 }
0x115b   :  { %v1010_v19 = vpop.permute.xlu0 %1009 }
0x115c   :  { %v1012_v20 = vadd.f32 %v1010_v19, %v1002_v18 }
0x115e   :  { %1197 = vtanh.f32 %v1012_v20 }
0x1164   :  { %v1198_v21 = vpop.eup %1197 }
0x1165   :  { %1015 = vrot.lane.b32.xlu2 %v1198_v21, %s1287_s26 }
0x118b   :  { %v957_v31 = vpop.permute.xlu1 %956 }
0x118c   :  { %v959_v32 = vadd.f32 %v957_v31, %v949_v30 }
0x118e   :  { %1199 = vtanh.f32 %v959_v32 }
0x1194   :  { %v1200_v33 = vpop.eup %1199 }
0x1195   :  { %962 = vrot.lane.b32.xlu0 %v1200_v33, %s1287_s26 }
0x11bf   :  { %v1016_v34 = vpop.permute.xlu2 %1015 }
0x11c0   :  { %v1018_v35 = vmul.f32 %v1016_v34, %v998_v11 }
0x11c2   :  { %v1042_v38 = vrot.slane %v1018_v35, 6 }
0x11c4   :  { %1043 = vrot.lane.b32.xlu2 %v1042_v38, %s1288_s27 }
0x1207   :  { %v963_v39 = vpop.permute.xlu0 %962 }
0x1208   :  { %v965_v40 = vmul.f32 %v963_v39, %v948_v14 }
0x120a   :  { %967 = vrot.lane.b32.xlu1 %v965_v40, %s1288_s27 }
0x121e   :  { %v1044_v41 = vpop.permute.xlu2 %1043 }
0x121f   :  { %1129 = vmatmul.msk.f32.vlgmr.msra.gmra.mxu1 %vm124_vm1, %v1044_v41 }
0x127c   :  { %v968_v42 = vpop.permute.xlu1 %967 }
0x127d   :  { %1126 = vst.msk [vmem:[%s1650_s7 + $0xc] sm:$0x3] %vm242_vm2, %v968_v42  ;;  %1128 = vmatmul.msk.f32.vlgmr.msrb.gmra.mxu0 %vm124_vm1, %v968_v42 }
0x129c   :  { %v1064_v43 = vpop.f32.mrf.mxu1 }
0x12fa   :  { %v1038_v44 = vpop.f32.mrf.mxu0 }
0x12fb   :  { %v1065_v45 = vadd.f32 %v1064_v43, %v1038_v44 }
0x12fd   :  { %v1067_v46 = vadd.f32 %v1448_v37, %v1065_v45 }
0x12ff   :  { %1201 = vtanh.f32 %v1067_v46 }
0x1305   :  { %v1202_v47 = vpop.eup %1201 }
0x1306   :  { %1073 = vrot.lane.b32.xlu0 %v1202_v47, %s1287_s26  ;;  %v1069_v8 = vmul.f32 0.5, %v1202_v47 }
0x1308   :  { %v1070_v9 = vadd.f32 0.5, %v1069_v8 }
0x130a   :  { %v1071_v50 = vmul.f32 %v1070_v9, %v959_v32 }
0x1378   :  { %v1074_v48 = vpop.permute.xlu0 %1073 }
0x1379   :  { %v1076_v49 = vmul.f32 %v1074_v48, %v1070_v9 }
0x137b   :  { %1078 = vrot.lane.b32.xlu1 %v1076_v49, %s1288_s27 }
0x13ed   :  { %v1079_v51 = vpop.permute.xlu1 %1078 }
0x13ee   :  { %v1081_v52 = vadd.f32 %v1079_v51, %v1071_v50 }
0x13f0   :  { %1203 = vtanh.f32 %v1081_v52 }
0x13f6   :  { %v1204_v53 = vpop.eup %1203 }
0x13f7   :  { %1084 = vrot.lane.b32.xlu2 %v1204_v53, %s1287_s26 }
0x1451   :  { %v1085_v54 = vpop.permute.xlu2 %1084 }
0x1452   :  { %v1087_v55 = vmul.f32 %v1085_v54, %v1070_v9 }
0x1454   :  { %1089 = vrot.lane.b32.xlu0 %v1087_v55, %s1288_s27 }
0x14c6   :  { %v1090_v37 = vpop.permute.xlu0 %1089 }
0x14c7   :  { %1130 = vst.msk [vmem:[%s1650_s7 + $0xe] sm:$0x3] %vm242_vm2, %v1090_v37 }
0x14c8   :  { %1098 = vsyncpa [#allocation3], 1 }
0x14c9   :  { %1099 = vsyncpa [#allocation5], 1 }

</bundles_post_ra>
